<compile_context>
chip_gen: v5e
topology: v5e:2x2
jax: 0.10.0
libtpu: 0.0.40
codegen_flags: <defaults>
</compile_context>

<pallas_src>
import jax
import jax.numpy as jnp
from jax import lax
from jax.experimental import pallas as pl
from jax.experimental.pallas import tpu as pltpu


def _make_encoder_kernel(H, CT, BB, Tp, fuse_hh, unroll):
    """Grid-step kernel.  Static: H, time-chunk CT, batch-block BB, padded Tp."""
    H2, H3 = 2 * H, 3 * H
    f32 = jnp.float32

    def kernel(cnt_ref,        # [Tp] int32 SMEM (scalar prefetch): #valid rows at time t
               gi_ref,         # [CT, BB, 6H] f32 input-gate chunk (r/z hidden biases folded)
               whh_ref,        # [2H, 6H] block-diag (fused) or [2H, 3H] stacked (unfused)
               bhn_ref,        # [1, 2H]  b_hn (fwd | bwd) -- must stay inside r*(.)
               wfc_ref,        # [2H, D]
               bfc_ref,        # [1, D]
               out_f_ref,      # [CT, BB, H] forward outputs (chunk t)
               out_b_ref,      # [CT, BB, H] backward outputs (chunk n_t-1-t)
               hid_ref,        # [BB, D]  decoder-init hidden (written at last chunk)
               h_scr):         # [BB, 2H] persistent hidden carry across time chunks
        b_idx = pl.program_id(0)
        t_idx = pl.program_id(1)
        n_t = pl.num_programs(1)

        @pl.when(t_idx == 0)
        def _():
            h_scr[...] = jnp.zeros_like(h_scr)

        # Loop-invariant hoists (JAX does not CSE broadcast_in_dim).
        whh = whh_ref[...]
        bhn = bhn_ref[...]                                            # [1, 2H]
        row_ids = (lax.broadcasted_iota(jnp.int32, (BB, 1), 0)
                   + b_idx * BB)                                      # global batch rows
        t0 = t_idx * CT                                               # global time of s=0

        if fuse_hh:
            # One [BB,2H] x [2H,6H] block-diag matmul per step; gi/gh/bhn/h are laid
            # out gate-major: [r_f|r_b | z_f|z_b | n_f|n_b] so all gate math runs at
            # full [BB,2H] width and the carry needs no per-step concatenate.
            lane_is_fwd = lax.broadcasted_iota(jnp.int32, (1, H2), 1) < H

            def step(s, h):
                t = t0 + s                                            # forward time
                tb = Tp - 1 - t                                       # backward time
                gi = gi_ref[s]                                        # [BB, 6H]
                m2 = (row_ids < jnp.where(lane_is_fwd, cnt_ref[t], cnt_ref[tb])
                      ).astype(f32)                                   # [BB, 2H] validity

                gh = jnp.dot(h, whh, preferred_element_type=f32)      # [BB, 6H]
                r = jax.nn.sigmoid(gi[:, :H2] + gh[:, :H2])
                z = jax.nn.sigmoid(gi[:, H2:2 * H2] + gh[:, H2:2 * H2])
                n = jnp.tanh(gi[:, 2 * H2:] + r * (gh[:, 2 * H2:] + bhn))
                h_new = (1.0 - z) * n + z * h                         # [BB, 2H]

                masked = m2 * h_new                                   # zero past seq end
                out_f_ref[s] = masked[:, :H]
                out_b_ref[CT - 1 - s] = masked[:, H:]
                return masked + (1.0 - m2) * h                        # freeze past seq end

            h = lax.fori_loop(0, CT, step, h_scr[...], unroll=unroll)
            h_scr[...] = h

            @pl.when(t_idx == n_t - 1)
            def _():
                hid_ref[...] = jnp.tanh(
                    jnp.dot(h, wfc_ref[...], preferred_element_type=f32) + bfc_ref[...])
        else:
            # 2H exceeds one MXU pass: two back-to-back per-direction dots; carry the
            # halves as a tuple so no per-step concatenate is needed either.
            whh_f, whh_b = whh[:H], whh[H:]
            bhn_f, bhn_b = bhn[:, :H], bhn[:, H:]

            def gates(gi_d, gh_d, h_d, bhn_d):
                r = jax.nn.sigmoid(gi_d[:, :H] + gh_d[:, :H])
                z = jax.nn.sigmoid(gi_d[:, H:H2] + gh_d[:, H:H2])
                n = jnp.tanh(gi_d[:, H2:] + r * (gh_d[:, H2:] + bhn_d))
                return (1.0 - z) * n + z * h_d

            def step(s, carry):
                hf, hb = carry
                t = t0 + s
                tb = Tp - 1 - t
                gi = gi_ref[s]                                        # [BB, 6H]=[fwd|bwd]
                m_f = (row_ids < cnt_ref[t]).astype(f32)              # [BB, 1]
                m_b = (row_ids < cnt_ref[tb]).astype(f32)

                gh_f = jnp.dot(hf, whh_f, preferred_element_type=f32)
                gh_b = jnp.dot(hb, whh_b, preferred_element_type=f32)
                hf_new = gates(gi[:, :H3], gh_f, hf, bhn_f)
                hb_new = gates(gi[:, H3:], gh_b, hb, bhn_b)

                out_f_ref[s] = m_f * hf_new
                out_b_ref[CT - 1 - s] = m_b * hb_new
                return (m_f * hf_new + (1.0 - m_f) * hf,
                        m_b * hb_new + (1.0 - m_b) * hb)

            hf, hb = lax.fori_loop(0, CT, step, (h_scr[:, :H], h_scr[:, H:]),
                                   unroll=unroll)
            h_scr[:, :H] = hf
            h_scr[:, H:] = hb

            @pl.when(t_idx == n_t - 1)
            def _():
                h_cat = jnp.concatenate([hf, hb], axis=-1)
                hid_ref[...] = jnp.tanh(
                    jnp.dot(h_cat, wfc_ref[...], preferred_element_type=f32)
                    + bfc_ref[...])

    return kernel


def encoder_forward(src, src_len, params, *, t_chunk=None, b_block=None, fuse_hh=None):
    """src: [T, B] int32; src_len: [B] int32 descending with max == T."""
    f32 = jnp.float32
    T, B = src.shape
    H = params["whh_f"].shape[1]
    D = params["wfc"].shape[0]
    H2, H3, H6 = 2 * H, 3 * H, 6 * H

    if fuse_hh is None:
        # Block-diag fusion only while the contraction fits one MXU pass on every
        # chip generation (128 wide on v5e); otherwise two per-direction dots.
        fuse_hh = H2 <= 128

    # ---- pad batch to a sublane multiple of 8, time to a chunk multiple ----
    Bp = -(-B // 8) * 8
    if b_block is None:
        b_block = Bp
    assert b_block % 8 == 0
    Bp = -(-Bp // b_block) * b_block
    n_b = Bp // b_block
    CT = t_chunk if t_chunk is not None else min(T, 8)
    Tp = -(-T // CT) * CT
    n_t = Tp // CT

    # ---- embedding lookup (dropout = eval identity) ----
    emb = params["embedding"].astype(f32)[src]                          # [T, B, E]
    emb = jnp.pad(emb, ((0, Tp - T), (0, Bp - B), (0, 0)))

    # ---- single fused input projection for both directions (one big matmul) ----
    wih_cat = jnp.concatenate([params["wih_f"].astype(f32).T,
                               params["wih_b"].astype(f32).T], axis=1)  # [E, 6H]

    def fold_rz(bih, bhh):        # fold b_hr/b_hz into input bias; keep b_hn out
        bih, bhh = bih.astype(f32), bhh.astype(f32)
        return jnp.concatenate([bih[:H2] + bhh[:H2], bih[H2:]])

    bias_cat = jnp.concatenate([fold_rz(params["bih_f"], params["bhh_f"]),
                                fold_rz(params["bih_b"], params["bhh_b"])])
    gi_all = jnp.einsum("tbe,eg->tbg", emb, wih_cat) + bias_cat          # [Tp, Bp, 6H]
    gi_f = gi_all[..., :H3]
    gi_b = gi_all[::-1, :, H3:]              # backward stream, pre-reversed in time
    if fuse_hh:
        gi = jnp.concatenate([gi_f[..., :H],   gi_b[..., :H],            # gate-major
                              gi_f[..., H:H2], gi_b[..., H:H2],
                              gi_f[..., H2:],  gi_b[..., H2:]], axis=-1)
    else:
        gi = jnp.concatenate([gi_f, gi_b], axis=-1)                      # [fwd 3H|bwd 3H]

    # ---- recurrent weights ----
    wf = params["whh_f"].astype(f32).T                                   # [H, 3H]
    wb = params["whh_b"].astype(f32).T
    if fuse_hh:
        zH = jnp.zeros((H, H), f32)
        cols = [jnp.concatenate(
                    [jnp.concatenate([wf[:, g * H:(g + 1) * H], zH], axis=1),
                     jnp.concatenate([zH, wb[:, g * H:(g + 1) * H]], axis=1)], axis=0)
                for g in range(3)]
        whh = jnp.concatenate(cols, axis=1)                              # [2H, 6H]
    else:
        whh = jnp.concatenate([wf, wb], axis=0)                          # [2H, 3H]
    bhn = jnp.concatenate([params["bhh_f"][H2:],
                           params["bhh_b"][H2:]]).astype(f32)[None, :]   # [1, 2H]
    wfc = params["wfc"].astype(f32).T                                    # [2H, D]
    bfc = params["bfc"].astype(f32)[None, :]                             # [1, D]
    # TODO(synk): bf16 MXU operands (gi/whh/wfc) on v6e/v7x; f32 kept for the 1e-4 check.

    # ---- pack_padded mask as a per-timestep valid-row count (src_len descending) ----
    valid_cnt = jnp.sum(src_len.astype(jnp.int32)[None, :]
                        > jnp.arange(Tp, dtype=jnp.int32)[:, None],
                        axis=1).astype(jnp.int32)                        # [Tp]

    kernel = _make_encoder_kernel(H, CT, b_block, Tp, fuse_hh,
                                  unroll=CT if CT <= 8 else 4)

    grid_spec = pltpu.PrefetchScalarGridSpec(
        num_scalar_prefetch=1,
        grid=(n_b, n_t),
        in_specs=[
            pl.BlockSpec((CT, b_block, H6), lambda b, t, vc: (t, b, 0)),
            pl.BlockSpec(whh.shape, lambda b, t, vc: (0, 0)),
            pl.BlockSpec((1, H2), lambda b, t, vc: (0, 0)),
            pl.BlockSpec((H2, D), lambda b, t, vc: (0, 0)),
            pl.BlockSpec((1, D), lambda b, t, vc: (0, 0)),
        ],
        out_specs=(
            pl.BlockSpec((CT, b_block, H), lambda b, t, vc: (t, b, 0)),
            pl.BlockSpec((CT, b_block, H), lambda b, t, vc: (n_t - 1 - t, b, 0)),
            pl.BlockSpec((b_block, D), lambda b, t, vc: (b, 0)),
        ),
        scratch_shapes=[pltpu.VMEM((b_block, H2), jnp.float32)],
    )

    # ---- VMEM budget: double-buffered chunk streams + resident weights/carry ----
    by = 4
    chunk_bytes = CT * b_block * (H6 + 2 * H) * by
    resident = (whh.size + wfc.size + H2 + D + b_block * (D + H2)) * by
    vmem_limit = int(min(max(4 * chunk_bytes + resident, 32 * 2 ** 20),
                         60 * 2 ** 20))          # stay under v7x's 64 MiB physical VMEM

    mm_w = H6 if fuse_hh else H3
    cost = pl.CostEstimate(
        flops=int(Tp * Bp * (2 * H2 * mm_w + 12 * H2) + 2 * Bp * H2 * D),
        transcendentals=int(3 * Tp * Bp * H2 + Bp * D),
        bytes_accessed=int(by * (gi.size + 2 * Tp * Bp * H + Bp * D
                                 + whh.size + wfc.size + H2 + D) + 4 * Tp),
    )

    out_f, out_b, hidden = pl.pallas_call(
        kernel,
        out_shape=(jax.ShapeDtypeStruct((Tp, Bp, H), f32),
                   jax.ShapeDtypeStruct((Tp, Bp, H), f32),
                   jax.ShapeDtypeStruct((Bp, D), f32)),
        grid_spec=grid_spec,
        compiler_params=pltpu.CompilerParams(
            dimension_semantics=("parallel", "arbitrary"),
            vmem_limit_bytes=vmem_limit),
        cost_estimate=cost,
    )(valid_cnt, gi, whh, bhn, wfc, bfc)

    outputs = jnp.concatenate([out_f[:T, :B], out_b[:T, :B]], axis=-1)   # [T, B, 2H]
    return outputs, hidden[:B]


def _reference_forward(src, src_len, params):
    """Pure-JAX reference with the original (unfused) weights."""
    emb = params["embedding"][src].astype(jnp.float32)
    T, B, _ = emb.shape
    H = params["whh_f"].shape[1]

    def cell(x_t, h, wih, whh, bih, bhh):
        gi = x_t @ wih.T + bih
        gh = h @ whh.T + bhh
        r = jax.nn.sigmoid(gi[:, :H] + gh[:, :H])
        z = jax.nn.sigmoid(gi[:, H:2 * H] + gh[:, H:2 * H])
        n = jnp.tanh(gi[:, 2 * H:] + r * gh[:, 2 * H:])
        return (1.0 - z) * n + z * h

    lens = src_len[:, None]
    h_f = jnp.zeros((B, H), jnp.float32)
    h_b = jnp.zeros((B, H), jnp.float32)
    out_f = jnp.zeros((T, B, H), jnp.float32)
    out_b = jnp.zeros((T, B, H), jnp.float32)
    for t in range(T):
        hf_new = cell(emb[t], h_f, params["wih_f"], params["whh_f"],
                      params["bih_f"], params["bhh_f"])
        vf = t < lens
        h_f = jnp.where(vf, hf_new, h_f)
        out_f = out_f.at[t].set(jnp.where(vf, hf_new, 0.0))

        tb = T - 1 - t
        hb_new = cell(emb[tb], h_b, params["wih_b"], params["whh_b"],
                      params["bih_b"], params["bhh_b"])
        vb = tb < lens
        h_b = jnp.where(vb, hb_new, h_b)
        out_b = out_b.at[tb].set(jnp.where(vb, hb_new, 0.0))

    outputs = jnp.concatenate([out_f, out_b], axis=-1)
    hidden = jnp.tanh(jnp.concatenate([h_f, h_b], axis=-1) @ params["wfc"].T
                      + params["bfc"])
    return outputs, hidden


def init_params(key, input_dim, emb_dim, enc_hid_dim, dec_hid_dim):
    ks = jax.random.split(key, 12)
    H, E, D = enc_hid_dim, emb_dim, dec_hid_dim
    u = lambda k, shape, bound: jax.random.uniform(k, shape, jnp.float32, -bound, bound)
    kb = 1.0 / jnp.sqrt(H)
    return {
        "embedding": jax.random.normal(ks[0], (input_dim, E), jnp.float32),
        "wih_f": u(ks[1], (3 * H, E), kb), "whh_f": u(ks[2], (3 * H, H), kb),
        "bih_f": u(ks[3], (3 * H,), kb),   "bhh_f": u(ks[4], (3 * H,), kb),
        "wih_b": u(ks[5], (3 * H, E), kb), "whh_b": u(ks[6], (3 * H, H), kb),
        "bih_b": u(ks[7], (3 * H,), kb),   "bhh_b": u(ks[8], (3 * H,), kb),
        "wfc": u(ks[9], (D, 2 * H), 1.0 / jnp.sqrt(2 * H)),
        "bfc": u(ks[10], (D,), 1.0 / jnp.sqrt(2 * H)),
    }


if __name__ == "__main__":
    INPUT_DIM, EMB_DIM, ENC_HID, DEC_HID = 50, 16, 32, 32
    T, B = 8, 4

    key = jax.random.PRNGKey(0)
    k_param, k_src = jax.random.split(key)
    params = init_params(k_param, INPUT_DIM, EMB_DIM, ENC_HID, DEC_HID)

    src = jax.random.randint(k_src, (T, B), 0, INPUT_DIM, dtype=jnp.int32)
    src_len = jnp.array([8, 7, 5, 3], dtype=jnp.int32)   # descending (pack_padded req.)

    ref_out, ref_hid = _reference_forward(src, src_len, params)

    # Fused block-diag recurrent matmul (2H <= 128), 2 time chunks -> exercises the
    # persistent-scratch carry, reversed backward chunk mapping, and output streaming.
    outputs, hidden = encoder_forward(src, src_len, params, t_chunk=4)
    jax.block_until_ready((outputs, hidden))
    assert outputs.shape == (T, B, 2 * ENC_HID)
    assert hidden.shape == (B, DEC_HID)
    assert jnp.allclose(outputs, ref_out, atol=1e-4, rtol=1e-4)
    assert jnp.allclose(hidden, ref_hid, atol=1e-4, rtol=1e-4)

    # Size-aware fallback path (two per-direction recurrent dots), forced for coverage.
    outputs2, hidden2 = encoder_forward(src, src_len, params, t_chunk=4, fuse_hh=False)
    jax.block_until_ready((outputs2, hidden2))
    assert jnp.allclose(outputs2, ref_out, atol=1e-4, rtol=1e-4)
    assert jnp.allclose(hidden2, ref_hid, atol=1e-4, rtol=1e-4)

    print("KERNEL_OK")
</pallas_src>

<mosaic_0001>
module attributes {stable_mosaic.version = 11 : i64} {
  func.func @kernel(%arg0: i32, %arg1: i32, %arg2: memref<8xi32, #tpu.memory_space<smem>>, %arg3: memref<4x8x192xf32, #tpu.memory_space<vmem>>, %arg4: memref<64x192xf32, #tpu.memory_space<vmem>>, %arg5: memref<1x64xf32, #tpu.memory_space<vmem>>, %arg6: memref<64x32xf32, #tpu.memory_space<vmem>>, %arg7: memref<1x32xf32, #tpu.memory_space<vmem>>, %arg8: memref<4x8x32xf32, #tpu.memory_space<vmem>>, %arg9: memref<4x8x32xf32, #tpu.memory_space<vmem>>, %arg10: memref<8x32xf32, #tpu.memory_space<vmem>>, %arg11: memref<8x64xf32, #tpu.memory_space<vmem>>) attributes {dimension_semantics = [#tpu.dimension_semantics<parallel>, #tpu.dimension_semantics<arbitrary>], iteration_bounds = array<i64: 1, 2>, scalar_prefetch = 1 : i64, scratch_operands = 1 : i64, tpu.core_type = #tpu.core_type<tc>, window_params = [{transform_indices = @transform_0, window_bounds = array<i64: 4, 8, 192>}, {pipeline_mode = #tpu.pipeline_mode<synchronous>, transform_indices = @transform_1, window_bounds = array<i64: 64, 192>}, {pipeline_mode = #tpu.pipeline_mode<synchronous>, transform_indices = @transform_2, window_bounds = array<i64: 1, 64>}, {pipeline_mode = #tpu.pipeline_mode<synchronous>, transform_indices = @transform_3, window_bounds = array<i64: 64, 32>}, {pipeline_mode = #tpu.pipeline_mode<synchronous>, transform_indices = @transform_4, window_bounds = array<i64: 1, 32>}, {transform_indices = @transform_5, window_bounds = array<i64: 4, 8, 32>}, {transform_indices = @transform_6, window_bounds = array<i64: 4, 8, 32>}, {transform_indices = @transform_7, window_bounds = array<i64: 8, 32>}]} {
    %c0_i32 = arith.constant 0 : i32
    %0 = arith.cmpi eq, %arg1, %c0_i32 : i32
    %1 = arith.extui %0 : i1 to i32
    %c0_i32_0 = arith.constant 0 : i32
    %2 = arith.cmpi ne, %1, %c0_i32_0 : i32
    scf.if %2 {
      %cst_62 = arith.constant 0.000000e+00 : f32
      %266 = vector.broadcast %cst_62 : f32 to vector<8x64xf32>
      %c0_63 = arith.constant 0 : index
      %c0_64 = arith.constant 0 : index
      %267 = vector.load %arg11[%c0_63, %c0_64] : memref<8x64xf32, #tpu.memory_space<vmem>>, vector<8x64xf32>
      tpu.vector_store %arg11[%c0_63, %c0_64], %266 {strides = array<i32>} : memref<8x64xf32, #tpu.memory_space<vmem>>, vector<8x64xf32>,
    } else {
    }
    %c0 = arith.constant 0 : index
    %c0_1 = arith.constant 0 : index
    %3 = vector.load %arg4[%c0, %c0_1] : memref<64x192xf32, #tpu.memory_space<vmem>>, vector<64x192xf32>
    %c0_2 = arith.constant 0 : index
    %c0_3 = arith.constant 0 : index
    %4 = vector.load %arg5[%c0_2, %c0_3] : memref<1x64xf32, #tpu.memory_space<vmem>>, vector<1x64xf32>
    %5 = tpu.iota {dimensions = array<i32: 0>} : vector<8x1xi32>
    %c8_i32 = arith.constant 8 : i32
    %6 = arith.muli %arg0, %c8_i32 : i32
    %7 = vector.broadcast %6 : i32 to vector<8x1xi32>
    %8 = arith.addi %5, %7 : vector<8x1xi32>
    %c4_i32 = arith.constant 4 : i32
    %9 = arith.muli %arg1, %c4_i32 : i32
    %10 = tpu.iota {dimensions = array<i32: 1>} : vector<1x64xi32>
    %c32_i32 = arith.constant 32 : i32
    %11 = vector.broadcast %c32_i32 : i32 to vector<1x64xi32>
    %12 = arith.cmpi slt, %10, %11 : vector<1x64xi32>
    %c0_4 = arith.constant 0 : index
    %c0_5 = arith.constant 0 : index
    %13 = vector.load %arg11[%c0_4, %c0_5] : memref<8x64xf32, #tpu.memory_space<vmem>>, vector<8x64xf32>
    %c0_i32_6 = arith.constant 0 : i32
    %14 = arith.addi %9, %c0_i32_6 : i32
    %c7_i32 = arith.constant 7 : i32
    %15 = arith.subi %c7_i32, %14 : i32
    %16 = arith.index_cast %c0_i32_6 : i32 to index
    %c0_7 = arith.constant 0 : index
    %c0_8 = arith.constant 0 : index
    %17 = vector.load %arg3[%16, %c0_7, %c0_8] : memref<4x8x192xf32, #tpu.memory_space<vmem>>, vector<1x8x192xf32>
    %18 = vector.shape_cast %17 : vector<1x8x192xf32> to vector<8x192xf32>
    %19 = arith.index_cast %14 : i32 to index
    %20 = memref.load %arg2[%19] : memref<8xi32, #tpu.memory_space<smem>>
    %21 = arith.index_cast %15 : i32 to index
    %22 = memref.load %arg2[%21] : memref<8xi32, #tpu.memory_space<smem>>
    %23 = vector.broadcast %20 : i32 to vector<1x64xi32>
    %24 = vector.broadcast %22 : i32 to vector<1x64xi32>
    %25 = arith.select %12, %23, %24 : vector<1x64xi1>, vector<1x64xi32>
    %26 = vector.broadcast %8 : vector<8x1xi32> to vector<8x64xi32>
    %27 = vector.broadcast %25 : vector<1x64xi32> to vector<8x64xi32>
    %28 = arith.cmpi slt, %26, %27 : vector<8x64xi32>
    %29 = arith.extui %28 : vector<8x64xi1> to vector<8x64xi32>
    %30 = arith.sitofp %29 : vector<8x64xi32> to vector<8x64xf32>
    %cst = arith.constant dense<0.000000e+00> : vector<8x192xf32>
    %31 = tpu.matmul %13, %3, %cst {dimension_numbers = #tpu.dot_dimension_numbers<[1], [0], [0], [1], [0, 0, 1, 1], [], []>} : vector<8x64xf32>, vector<64x192xf32>, vector<8x192xf32> -> vector<8x192xf32>
    %32 = vector.extract_strided_slice %18 {offsets = [0, 0], sizes = [8, 64], strides = [1, 1]} : vector<8x192xf32> to vector<8x64xf32>
    %33 = vector.extract_strided_slice %31 {offsets = [0, 0], sizes = [8, 64], strides = [1, 1]} : vector<8x192xf32> to vector<8x64xf32>
    %34 = arith.addf %32, %33 : vector<8x64xf32>
    %35 = arith.negf %34 : vector<8x64xf32>
    %36 = math.exp %35 : vector<8x64xf32>
    %cst_9 = arith.constant 1.000000e+00 : f32
    %37 = vector.broadcast %cst_9 : f32 to vector<8x64xf32>
    %38 = arith.addf %37, %36 : vector<8x64xf32>
    %39 = arith.divf %37, %38 : vector<8x64xf32>
    %40 = vector.extract_strided_slice %18 {offsets = [0, 64], sizes = [8, 64], strides = [1, 1]} : vector<8x192xf32> to vector<8x64xf32>
    %41 = vector.extract_strided_slice %31 {offsets = [0, 64], sizes = [8, 64], strides = [1, 1]} : vector<8x192xf32> to vector<8x64xf32>
    %42 = arith.addf %40, %41 : vector<8x64xf32>
    %43 = arith.negf %42 : vector<8x64xf32>
    %44 = math.exp %43 : vector<8x64xf32>
    %cst_10 = arith.constant 1.000000e+00 : f32
    %45 = vector.broadcast %cst_10 : f32 to vector<8x64xf32>
    %46 = arith.addf %45, %44 : vector<8x64xf32>
    %47 = arith.divf %45, %46 : vector<8x64xf32>
    %48 = vector.extract_strided_slice %18 {offsets = [0, 128], sizes = [8, 64], strides = [1, 1]} : vector<8x192xf32> to vector<8x64xf32>
    %49 = vector.extract_strided_slice %31 {offsets = [0, 128], sizes = [8, 64], strides = [1, 1]} : vector<8x192xf32> to vector<8x64xf32>
    %50 = vector.broadcast %4 : vector<1x64xf32> to vector<8x64xf32>
    %51 = arith.addf %49, %50 : vector<8x64xf32>
    %52 = arith.mulf %39, %51 : vector<8x64xf32>
    %53 = arith.addf %48, %52 : vector<8x64xf32>
    %54 = math.tanh %53 : vector<8x64xf32>
    %cst_11 = arith.constant 1.000000e+00 : f32
    %55 = vector.broadcast %cst_11 : f32 to vector<8x64xf32>
    %56 = arith.subf %55, %47 : vector<8x64xf32>
    %57 = arith.mulf %56, %54 : vector<8x64xf32>
    %58 = arith.mulf %47, %13 : vector<8x64xf32>
    %59 = arith.addf %57, %58 : vector<8x64xf32>
    %60 = arith.mulf %30, %59 : vector<8x64xf32>
    %61 = vector.extract_strided_slice %60 {offsets = [0, 0], sizes = [8, 32], strides = [1, 1]} : vector<8x64xf32> to vector<8x32xf32>
    %62 = arith.index_cast %c0_i32_6 : i32 to index
    %c0_12 = arith.constant 0 : index
    %c0_13 = arith.constant 0 : index
    %63 = vector.load %arg8[%62, %c0_12, %c0_13] : memref<4x8x32xf32, #tpu.memory_space<vmem>>, vector<1x8x32xf32>
    %64 = vector.shape_cast %63 : vector<1x8x32xf32> to vector<8x32xf32>
    %65 = vector.shape_cast %61 : vector<8x32xf32> to vector<1x8x32xf32>
    tpu.vector_store %arg8[%62, %c0_12, %c0_13], %65 {strides = array<i32>} : memref<4x8x32xf32, #tpu.memory_space<vmem>>, vector<1x8x32xf32>,
    %66 = vector.extract_strided_slice %60 {offsets = [0, 32], sizes = [8, 32], strides = [1, 1]} : vector<8x64xf32> to vector<8x32xf32>
    %c3_i32 = arith.constant 3 : i32
    %67 = arith.subi %c3_i32, %c0_i32_6 : i32
    %68 = arith.index_cast %67 : i32 to index
    %c0_14 = arith.constant 0 : index
    %c0_15 = arith.constant 0 : index
    %69 = vector.load %arg9[%68, %c0_14, %c0_15] : memref<4x8x32xf32, #tpu.memory_space<vmem>>, vector<1x8x32xf32>
    %70 = vector.shape_cast %69 : vector<1x8x32xf32> to vector<8x32xf32>
    %71 = vector.shape_cast %66 : vector<8x32xf32> to vector<1x8x32xf32>
    tpu.vector_store %arg9[%68, %c0_14, %c0_15], %71 {strides = array<i32>} : memref<4x8x32xf32, #tpu.memory_space<vmem>>, vector<1x8x32xf32>,
    %cst_16 = arith.constant 1.000000e+00 : f32
    %72 = vector.broadcast %cst_16 : f32 to vector<8x64xf32>
    %73 = arith.subf %72, %30 : vector<8x64xf32>
    %74 = arith.mulf %73, %13 : vector<8x64xf32>
    %75 = arith.addf %60, %74 : vector<8x64xf32>
    %c1_i32 = arith.constant 1 : i32
    %76 = arith.addi %9, %c1_i32 : i32
    %c7_i32_17 = arith.constant 7 : i32
    %77 = arith.subi %c7_i32_17, %76 : i32
    %78 = arith.index_cast %c1_i32 : i32 to index
    %c0_18 = arith.constant 0 : index
    %c0_19 = arith.constant 0 : index
    %79 = vector.load %arg3[%78, %c0_18, %c0_19] : memref<4x8x192xf32, #tpu.memory_space<vmem>>, vector<1x8x192xf32>
    %80 = vector.shape_cast %79 : vector<1x8x192xf32> to vector<8x192xf32>
    %81 = arith.index_cast %76 : i32 to index
    %82 = memref.load %arg2[%81] : memref<8xi32, #tpu.memory_space<smem>>
    %83 = arith.index_cast %77 : i32 to index
    %84 = memref.load %arg2[%83] : memref<8xi32, #tpu.memory_space<smem>>
    %85 = vector.broadcast %82 : i32 to vector<1x64xi32>
    %86 = vector.broadcast %84 : i32 to vector<1x64xi32>
    %87 = arith.select %12, %85, %86 : vector<1x64xi1>, vector<1x64xi32>
    %88 = vector.broadcast %8 : vector<8x1xi32> to vector<8x64xi32>
    %89 = vector.broadcast %87 : vector<1x64xi32> to vector<8x64xi32>
    %90 = arith.cmpi slt, %88, %89 : vector<8x64xi32>
    %91 = arith.extui %90 : vector<8x64xi1> to vector<8x64xi32>
    %92 = arith.sitofp %91 : vector<8x64xi32> to vector<8x64xf32>
    %cst_20 = arith.constant dense<0.000000e+00> : vector<8x192xf32>
    %93 = tpu.matmul %75, %3, %cst_20 {dimension_numbers = #tpu.dot_dimension_numbers<[1], [0], [0], [1], [0, 0, 1, 1], [], []>} : vector<8x64xf32>, vector<64x192xf32>, vector<8x192xf32> -> vector<8x192xf32>
    %94 = vector.extract_strided_slice %80 {offsets = [0, 0], sizes = [8, 64], strides = [1, 1]} : vector<8x192xf32> to vector<8x64xf32>
    %95 = vector.extract_strided_slice %93 {offsets = [0, 0], sizes = [8, 64], strides = [1, 1]} : vector<8x192xf32> to vector<8x64xf32>
    %96 = arith.addf %94, %95 : vector<8x64xf32>
    %97 = arith.negf %96 : vector<8x64xf32>
    %98 = math.exp %97 : vector<8x64xf32>
    %cst_21 = arith.constant 1.000000e+00 : f32
    %99 = vector.broadcast %cst_21 : f32 to vector<8x64xf32>
    %100 = arith.addf %99, %98 : vector<8x64xf32>
    %101 = arith.divf %99, %100 : vector<8x64xf32>
    %102 = vector.extract_strided_slice %80 {offsets = [0, 64], sizes = [8, 64], strides = [1, 1]} : vector<8x192xf32> to vector<8x64xf32>
    %103 = vector.extract_strided_slice %93 {offsets = [0, 64], sizes = [8, 64], strides = [1, 1]} : vector<8x192xf32> to vector<8x64xf32>
    %104 = arith.addf %102, %103 : vector<8x64xf32>
    %105 = arith.negf %104 : vector<8x64xf32>
    %106 = math.exp %105 : vector<8x64xf32>
    %cst_22 = arith.constant 1.000000e+00 : f32
    %107 = vector.broadcast %cst_22 : f32 to vector<8x64xf32>
    %108 = arith.addf %107, %106 : vector<8x64xf32>
    %109 = arith.divf %107, %108 : vector<8x64xf32>
    %110 = vector.extract_strided_slice %80 {offsets = [0, 128], sizes = [8, 64], strides = [1, 1]} : vector<8x192xf32> to vector<8x64xf32>
    %111 = vector.extract_strided_slice %93 {offsets = [0, 128], sizes = [8, 64], strides = [1, 1]} : vector<8x192xf32> to vector<8x64xf32>
    %112 = vector.broadcast %4 : vector<1x64xf32> to vector<8x64xf32>
    %113 = arith.addf %111, %112 : vector<8x64xf32>
    %114 = arith.mulf %101, %113 : vector<8x64xf32>
    %115 = arith.addf %110, %114 : vector<8x64xf32>
    %116 = math.tanh %115 : vector<8x64xf32>
    %cst_23 = arith.constant 1.000000e+00 : f32
    %117 = vector.broadcast %cst_23 : f32 to vector<8x64xf32>
    %118 = arith.subf %117, %109 : vector<8x64xf32>
    %119 = arith.mulf %118, %116 : vector<8x64xf32>
    %120 = arith.mulf %109, %75 : vector<8x64xf32>
    %121 = arith.addf %119, %120 : vector<8x64xf32>
    %122 = arith.mulf %92, %121 : vector<8x64xf32>
    %123 = vector.extract_strided_slice %122 {offsets = [0, 0], sizes = [8, 32], strides = [1, 1]} : vector<8x64xf32> to vector<8x32xf32>
    %124 = arith.index_cast %c1_i32 : i32 to index
    %c0_24 = arith.constant 0 : index
    %c0_25 = arith.constant 0 : index
    %125 = vector.load %arg8[%124, %c0_24, %c0_25] : memref<4x8x32xf32, #tpu.memory_space<vmem>>, vector<1x8x32xf32>
    %126 = vector.shape_cast %125 : vector<1x8x32xf32> to vector<8x32xf32>
    %127 = vector.shape_cast %123 : vector<8x32xf32> to vector<1x8x32xf32>
    tpu.vector_store %arg8[%124, %c0_24, %c0_25], %127 {strides = array<i32>} : memref<4x8x32xf32, #tpu.memory_space<vmem>>, vector<1x8x32xf32>,
    %128 = vector.extract_strided_slice %122 {offsets = [0, 32], sizes = [8, 32], strides = [1, 1]} : vector<8x64xf32> to vector<8x32xf32>
    %c3_i32_26 = arith.constant 3 : i32
    %129 = arith.subi %c3_i32_26, %c1_i32 : i32
    %130 = arith.index_cast %129 : i32 to index
    %c0_27 = arith.constant 0 : index
    %c0_28 = arith.constant 0 : index
    %131 = vector.load %arg9[%130, %c0_27, %c0_28] : memref<4x8x32xf32, #tpu.memory_space<vmem>>, vector<1x8x32xf32>
    %132 = vector.shape_cast %131 : vector<1x8x32xf32> to vector<8x32xf32>
    %133 = vector.shape_cast %128 : vector<8x32xf32> to vector<1x8x32xf32>
    tpu.vector_store %arg9[%130, %c0_27, %c0_28], %133 {strides = array<i32>} : memref<4x8x32xf32, #tpu.memory_space<vmem>>, vector<1x8x32xf32>,
    %cst_29 = arith.constant 1.000000e+00 : f32
    %134 = vector.broadcast %cst_29 : f32 to vector<8x64xf32>
    %135 = arith.subf %134, %92 : vector<8x64xf32>
    %136 = arith.mulf %135, %75 : vector<8x64xf32>
    %137 = arith.addf %122, %136 : vector<8x64xf32>
    %c2_i32 = arith.constant 2 : i32
    %138 = arith.addi %9, %c2_i32 : i32
    %c7_i32_30 = arith.constant 7 : i32
    %139 = arith.subi %c7_i32_30, %138 : i32
    %140 = arith.index_cast %c2_i32 : i32 to index
    %c0_31 = arith.constant 0 : index
    %c0_32 = arith.constant 0 : index
    %141 = vector.load %arg3[%140, %c0_31, %c0_32] : memref<4x8x192xf32, #tpu.memory_space<vmem>>, vector<1x8x192xf32>
    %142 = vector.shape_cast %141 : vector<1x8x192xf32> to vector<8x192xf32>
    %143 = arith.index_cast %138 : i32 to index
    %144 = memref.load %arg2[%143] : memref<8xi32, #tpu.memory_space<smem>>
    %145 = arith.index_cast %139 : i32 to index
    %146 = memref.load %arg2[%145] : memref<8xi32, #tpu.memory_space<smem>>
    %147 = vector.broadcast %144 : i32 to vector<1x64xi32>
    %148 = vector.broadcast %146 : i32 to vector<1x64xi32>
    %149 = arith.select %12, %147, %148 : vector<1x64xi1>, vector<1x64xi32>
    %150 = vector.broadcast %8 : vector<8x1xi32> to vector<8x64xi32>
    %151 = vector.broadcast %149 : vector<1x64xi32> to vector<8x64xi32>
    %152 = arith.cmpi slt, %150, %151 : vector<8x64xi32>
    %153 = arith.extui %152 : vector<8x64xi1> to vector<8x64xi32>
    %154 = arith.sitofp %153 : vector<8x64xi32> to vector<8x64xf32>
    %cst_33 = arith.constant dense<0.000000e+00> : vector<8x192xf32>
    %155 = tpu.matmul %137, %3, %cst_33 {dimension_numbers = #tpu.dot_dimension_numbers<[1], [0], [0], [1], [0, 0, 1, 1], [], []>} : vector<8x64xf32>, vector<64x192xf32>, vector<8x192xf32> -> vector<8x192xf32>
    %156 = vector.extract_strided_slice %142 {offsets = [0, 0], sizes = [8, 64], strides = [1, 1]} : vector<8x192xf32> to vector<8x64xf32>
    %157 = vector.extract_strided_slice %155 {offsets = [0, 0], sizes = [8, 64], strides = [1, 1]} : vector<8x192xf32> to vector<8x64xf32>
    %158 = arith.addf %156, %157 : vector<8x64xf32>
    %159 = arith.negf %158 : vector<8x64xf32>
    %160 = math.exp %159 : vector<8x64xf32>
    %cst_34 = arith.constant 1.000000e+00 : f32
    %161 = vector.broadcast %cst_34 : f32 to vector<8x64xf32>
    %162 = arith.addf %161, %160 : vector<8x64xf32>
    %163 = arith.divf %161, %162 : vector<8x64xf32>
    %164 = vector.extract_strided_slice %142 {offsets = [0, 64], sizes = [8, 64], strides = [1, 1]} : vector<8x192xf32> to vector<8x64xf32>
    %165 = vector.extract_strided_slice %155 {offsets = [0, 64], sizes = [8, 64], strides = [1, 1]} : vector<8x192xf32> to vector<8x64xf32>
    %166 = arith.addf %164, %165 : vector<8x64xf32>
    %167 = arith.negf %166 : vector<8x64xf32>
    %168 = math.exp %167 : vector<8x64xf32>
    %cst_35 = arith.constant 1.000000e+00 : f32
    %169 = vector.broadcast %cst_35 : f32 to vector<8x64xf32>
    %170 = arith.addf %169, %168 : vector<8x64xf32>
    %171 = arith.divf %169, %170 : vector<8x64xf32>
    %172 = vector.extract_strided_slice %142 {offsets = [0, 128], sizes = [8, 64], strides = [1, 1]} : vector<8x192xf32> to vector<8x64xf32>
    %173 = vector.extract_strided_slice %155 {offsets = [0, 128], sizes = [8, 64], strides = [1, 1]} : vector<8x192xf32> to vector<8x64xf32>
    %174 = vector.broadcast %4 : vector<1x64xf32> to vector<8x64xf32>
    %175 = arith.addf %173, %174 : vector<8x64xf32>
    %176 = arith.mulf %163, %175 : vector<8x64xf32>
    %177 = arith.addf %172, %176 : vector<8x64xf32>
    %178 = math.tanh %177 : vector<8x64xf32>
    %cst_36 = arith.constant 1.000000e+00 : f32
    %179 = vector.broadcast %cst_36 : f32 to vector<8x64xf32>
    %180 = arith.subf %179, %171 : vector<8x64xf32>
    %181 = arith.mulf %180, %178 : vector<8x64xf32>
    %182 = arith.mulf %171, %137 : vector<8x64xf32>
    %183 = arith.addf %181, %182 : vector<8x64xf32>
    %184 = arith.mulf %154, %183 : vector<8x64xf32>
    %185 = vector.extract_strided_slice %184 {offsets = [0, 0], sizes = [8, 32], strides = [1, 1]} : vector<8x64xf32> to vector<8x32xf32>
    %186 = arith.index_cast %c2_i32 : i32 to index
    %c0_37 = arith.constant 0 : index
    %c0_38 = arith.constant 0 : index
    %187 = vector.load %arg8[%186, %c0_37, %c0_38] : memref<4x8x32xf32, #tpu.memory_space<vmem>>, vector<1x8x32xf32>
    %188 = vector.shape_cast %187 : vector<1x8x32xf32> to vector<8x32xf32>
    %189 = vector.shape_cast %185 : vector<8x32xf32> to vector<1x8x32xf32>
    tpu.vector_store %arg8[%186, %c0_37, %c0_38], %189 {strides = array<i32>} : memref<4x8x32xf32, #tpu.memory_space<vmem>>, vector<1x8x32xf32>,
    %190 = vector.extract_strided_slice %184 {offsets = [0, 32], sizes = [8, 32], strides = [1, 1]} : vector<8x64xf32> to vector<8x32xf32>
    %c3_i32_39 = arith.constant 3 : i32
    %191 = arith.subi %c3_i32_39, %c2_i32 : i32
    %192 = arith.index_cast %191 : i32 to index
    %c0_40 = arith.constant 0 : index
    %c0_41 = arith.constant 0 : index
    %193 = vector.load %arg9[%192, %c0_40, %c0_41] : memref<4x8x32xf32, #tpu.memory_space<vmem>>, vector<1x8x32xf32>
    %194 = vector.shape_cast %193 : vector<1x8x32xf32> to vector<8x32xf32>
    %195 = vector.shape_cast %190 : vector<8x32xf32> to vector<1x8x32xf32>
    tpu.vector_store %arg9[%192, %c0_40, %c0_41], %195 {strides = array<i32>} : memref<4x8x32xf32, #tpu.memory_space<vmem>>, vector<1x8x32xf32>,
    %cst_42 = arith.constant 1.000000e+00 : f32
    %196 = vector.broadcast %cst_42 : f32 to vector<8x64xf32>
    %197 = arith.subf %196, %154 : vector<8x64xf32>
    %198 = arith.mulf %197, %137 : vector<8x64xf32>
    %199 = arith.addf %184, %198 : vector<8x64xf32>
    %c3_i32_43 = arith.constant 3 : i32
    %200 = arith.addi %9, %c3_i32_43 : i32
    %c7_i32_44 = arith.constant 7 : i32
    %201 = arith.subi %c7_i32_44, %200 : i32
    %202 = arith.index_cast %c3_i32_43 : i32 to index
    %c0_45 = arith.constant 0 : index
    %c0_46 = arith.constant 0 : index
    %203 = vector.load %arg3[%202, %c0_45, %c0_46] : memref<4x8x192xf32, #tpu.memory_space<vmem>>, vector<1x8x192xf32>
    %204 = vector.shape_cast %203 : vector<1x8x192xf32> to vector<8x192xf32>
    %205 = arith.index_cast %200 : i32 to index
    %206 = memref.load %arg2[%205] : memref<8xi32, #tpu.memory_space<smem>>
    %207 = arith.index_cast %201 : i32 to index
    %208 = memref.load %arg2[%207] : memref<8xi32, #tpu.memory_space<smem>>
    %209 = vector.broadcast %206 : i32 to vector<1x64xi32>
    %210 = vector.broadcast %208 : i32 to vector<1x64xi32>
    %211 = arith.select %12, %209, %210 : vector<1x64xi1>, vector<1x64xi32>
    %212 = vector.broadcast %8 : vector<8x1xi32> to vector<8x64xi32>
    %213 = vector.broadcast %211 : vector<1x64xi32> to vector<8x64xi32>
    %214 = arith.cmpi slt, %212, %213 : vector<8x64xi32>
    %215 = arith.extui %214 : vector<8x64xi1> to vector<8x64xi32>
    %216 = arith.sitofp %215 : vector<8x64xi32> to vector<8x64xf32>
    %cst_47 = arith.constant dense<0.000000e+00> : vector<8x192xf32>
    %217 = tpu.matmul %199, %3, %cst_47 {dimension_numbers = #tpu.dot_dimension_numbers<[1], [0], [0], [1], [0, 0, 1, 1], [], []>} : vector<8x64xf32>, vector<64x192xf32>, vector<8x192xf32> -> vector<8x192xf32>
    %218 = vector.extract_strided_slice %204 {offsets = [0, 0], sizes = [8, 64], strides = [1, 1]} : vector<8x192xf32> to vector<8x64xf32>
    %219 = vector.extract_strided_slice %217 {offsets = [0, 0], sizes = [8, 64], strides = [1, 1]} : vector<8x192xf32> to vector<8x64xf32>
    %220 = arith.addf %218, %219 : vector<8x64xf32>
    %221 = arith.negf %220 : vector<8x64xf32>
    %222 = math.exp %221 : vector<8x64xf32>
    %cst_48 = arith.constant 1.000000e+00 : f32
    %223 = vector.broadcast %cst_48 : f32 to vector<8x64xf32>
    %224 = arith.addf %223, %222 : vector<8x64xf32>
    %225 = arith.divf %223, %224 : vector<8x64xf32>
    %226 = vector.extract_strided_slice %204 {offsets = [0, 64], sizes = [8, 64], strides = [1, 1]} : vector<8x192xf32> to vector<8x64xf32>
    %227 = vector.extract_strided_slice %217 {offsets = [0, 64], sizes = [8, 64], strides = [1, 1]} : vector<8x192xf32> to vector<8x64xf32>
    %228 = arith.addf %226, %227 : vector<8x64xf32>
    %229 = arith.negf %228 : vector<8x64xf32>
    %230 = math.exp %229 : vector<8x64xf32>
    %cst_49 = arith.constant 1.000000e+00 : f32
    %231 = vector.broadcast %cst_49 : f32 to vector<8x64xf32>
    %232 = arith.addf %231, %230 : vector<8x64xf32>
    %233 = arith.divf %231, %232 : vector<8x64xf32>
    %234 = vector.extract_strided_slice %204 {offsets = [0, 128], sizes = [8, 64], strides = [1, 1]} : vector<8x192xf32> to vector<8x64xf32>
    %235 = vector.extract_strided_slice %217 {offsets = [0, 128], sizes = [8, 64], strides = [1, 1]} : vector<8x192xf32> to vector<8x64xf32>
    %236 = vector.broadcast %4 : vector<1x64xf32> to vector<8x64xf32>
    %237 = arith.addf %235, %236 : vector<8x64xf32>
    %238 = arith.mulf %225, %237 : vector<8x64xf32>
    %239 = arith.addf %234, %238 : vector<8x64xf32>
    %240 = math.tanh %239 : vector<8x64xf32>
    %cst_50 = arith.constant 1.000000e+00 : f32
    %241 = vector.broadcast %cst_50 : f32 to vector<8x64xf32>
    %242 = arith.subf %241, %233 : vector<8x64xf32>
    %243 = arith.mulf %242, %240 : vector<8x64xf32>
    %244 = arith.mulf %233, %199 : vector<8x64xf32>
    %245 = arith.addf %243, %244 : vector<8x64xf32>
    %246 = arith.mulf %216, %245 : vector<8x64xf32>
    %247 = vector.extract_strided_slice %246 {offsets = [0, 0], sizes = [8, 32], strides = [1, 1]} : vector<8x64xf32> to vector<8x32xf32>
    %248 = arith.index_cast %c3_i32_43 : i32 to index
    %c0_51 = arith.constant 0 : index
    %c0_52 = arith.constant 0 : index
    %249 = vector.load %arg8[%248, %c0_51, %c0_52] : memref<4x8x32xf32, #tpu.memory_space<vmem>>, vector<1x8x32xf32>
    %250 = vector.shape_cast %249 : vector<1x8x32xf32> to vector<8x32xf32>
    %251 = vector.shape_cast %247 : vector<8x32xf32> to vector<1x8x32xf32>
    tpu.vector_store %arg8[%248, %c0_51, %c0_52], %251 {strides = array<i32>} : memref<4x8x32xf32, #tpu.memory_space<vmem>>, vector<1x8x32xf32>,
    %252 = vector.extract_strided_slice %246 {offsets = [0, 32], sizes = [8, 32], strides = [1, 1]} : vector<8x64xf32> to vector<8x32xf32>
    %c3_i32_53 = arith.constant 3 : i32
    %253 = arith.subi %c3_i32_53, %c3_i32_43 : i32
    %254 = arith.index_cast %253 : i32 to index
    %c0_54 = arith.constant 0 : index
    %c0_55 = arith.constant 0 : index
    %255 = vector.load %arg9[%254, %c0_54, %c0_55] : memref<4x8x32xf32, #tpu.memory_space<vmem>>, vector<1x8x32xf32>
    %256 = vector.shape_cast %255 : vector<1x8x32xf32> to vector<8x32xf32>
    %257 = vector.shape_cast %252 : vector<8x32xf32> to vector<1x8x32xf32>
    tpu.vector_store %arg9[%254, %c0_54, %c0_55], %257 {strides = array<i32>} : memref<4x8x32xf32, #tpu.memory_space<vmem>>, vector<1x8x32xf32>,
    %cst_56 = arith.constant 1.000000e+00 : f32
    %258 = vector.broadcast %cst_56 : f32 to vector<8x64xf32>
    %259 = arith.subf %258, %216 : vector<8x64xf32>
    %260 = arith.mulf %259, %199 : vector<8x64xf32>
    %261 = arith.addf %246, %260 : vector<8x64xf32>
    %c4_i32_57 = arith.constant 4 : i32
    %c0_58 = arith.constant 0 : index
    %c0_59 = arith.constant 0 : index
    %262 = vector.load %arg11[%c0_58, %c0_59] : memref<8x64xf32, #tpu.memory_space<vmem>>, vector<8x64xf32>
    tpu.vector_store %arg11[%c0_58, %c0_59], %261 {strides = array<i32>} : memref<8x64xf32, #tpu.memory_space<vmem>>, vector<8x64xf32>,
    %c1_i32_60 = arith.constant 1 : i32
    %263 = arith.cmpi eq, %arg1, %c1_i32_60 : i32
    %264 = arith.extui %263 : i1 to i32
    %c0_i32_61 = arith.constant 0 : i32
    %265 = arith.cmpi ne, %264, %c0_i32_61 : i32
    scf.if %265 {
      %c0_62 = arith.constant 0 : index
      %c0_63 = arith.constant 0 : index
      %266 = vector.load %arg6[%c0_62, %c0_63] : memref<64x32xf32, #tpu.memory_space<vmem>>, vector<64x32xf32>
      %cst_64 = arith.constant dense<0.000000e+00> : vector<8x32xf32>
      %267 = tpu.matmul %261, %266, %cst_64 {dimension_numbers = #tpu.dot_dimension_numbers<[1], [0], [0], [1], [0, 0, 1, 1], [], []>} : vector<8x64xf32>, vector<64x32xf32>, vector<8x32xf32> -> vector<8x32xf32>
      %c0_65 = arith.constant 0 : index
      %c0_66 = arith.constant 0 : index
      %268 = vector.load %arg7[%c0_65, %c0_66] : memref<1x32xf32, #tpu.memory_space<vmem>>, vector<1x32xf32>
      %269 = vector.broadcast %268 : vector<1x32xf32> to vector<8x32xf32>
      %270 = arith.addf %267, %269 : vector<8x32xf32>
      %271 = math.tanh %270 : vector<8x32xf32>
      %c0_67 = arith.constant 0 : index
      %c0_68 = arith.constant 0 : index
      %272 = vector.load %arg10[%c0_67, %c0_68] : memref<8x32xf32, #tpu.memory_space<vmem>>, vector<8x32xf32>
      tpu.vector_store %arg10[%c0_67, %c0_68], %271 {strides = array<i32>} : memref<8x32xf32, #tpu.memory_space<vmem>>, vector<8x32xf32>,
    } else {
    }
    return
  }
  func.func @transform_0(%arg0: i32, %arg1: i32, %arg2: memref<8xi32, #tpu.memory_space<smem>>) -> (i32, i32, i32) {
    %c0_i32 = arith.constant 0 : i32
    %c0_i32_0 = arith.constant 0 : i32
    return %arg1, %arg0, %c0_i32 : i32, i32, i32
  }
  func.func @transform_1(%arg0: i32, %arg1: i32, %arg2: memref<8xi32, #tpu.memory_space<smem>>) -> (i32, i32) {
    %c0_i32 = arith.constant 0 : i32
    %c0_i32_0 = arith.constant 0 : i32
    %c0_i32_1 = arith.constant 0 : i32
    return %c0_i32, %c0_i32_0 : i32, i32
  }
  func.func @transform_2(%arg0: i32, %arg1: i32, %arg2: memref<8xi32, #tpu.memory_space<smem>>) -> (i32, i32) {
    %c0_i32 = arith.constant 0 : i32
    %c0_i32_0 = arith.constant 0 : i32
    %c0_i32_1 = arith.constant 0 : i32
    return %c0_i32, %c0_i32_0 : i32, i32
  }
  func.func @transform_3(%arg0: i32, %arg1: i32, %arg2: memref<8xi32, #tpu.memory_space<smem>>) -> (i32, i32) {
    %c0_i32 = arith.constant 0 : i32
    %c0_i32_0 = arith.constant 0 : i32
    %c0_i32_1 = arith.constant 0 : i32
    return %c0_i32, %c0_i32_0 : i32, i32
  }
  func.func @transform_4(%arg0: i32, %arg1: i32, %arg2: memref<8xi32, #tpu.memory_space<smem>>) -> (i32, i32) {
    %c0_i32 = arith.constant 0 : i32
    %c0_i32_0 = arith.constant 0 : i32
    %c0_i32_1 = arith.constant 0 : i32
    return %c0_i32, %c0_i32_0 : i32, i32
  }
  func.func @transform_5(%arg0: i32, %arg1: i32, %arg2: memref<8xi32, #tpu.memory_space<smem>>) -> (i32, i32, i32) {
    %c0_i32 = arith.constant 0 : i32
    %c0_i32_0 = arith.constant 0 : i32
    return %arg1, %arg0, %c0_i32 : i32, i32, i32
  }
  func.func @transform_6(%arg0: i32, %arg1: i32, %arg2: memref<8xi32, #tpu.memory_space<smem>>) -> (i32, i32, i32) {
    %c1_i32 = arith.constant 1 : i32
    %0 = arith.subi %c1_i32, %arg1 : i32
    %c0_i32 = arith.constant 0 : i32
    %c0_i32_0 = arith.constant 0 : i32
    return %0, %arg0, %c0_i32 : i32, i32, i32
  }
  func.func @transform_7(%arg0: i32, %arg1: i32, %arg2: memref<8xi32, #tpu.memory_space<smem>>) -> (i32, i32) {
    %c0_i32 = arith.constant 0 : i32
    %c0_i32_0 = arith.constant 0 : i32
    return %arg0, %c0_i32 : i32, i32
  }
}

</mosaic_0001>

<bundles_post_ra>
// kernel: tpu_custom_call.1
= control target key start
LH: loop header
LB: loop body
LE: loop exit
PB: predicated region body
PF: predicated region fallthrough
CT: control target
= control target key end

     0   :  { %s1524_s30 = smov [#allocation4]   ;;  %s1949_s0 = inlined_call_operand.vmem [shape: s32[8], index: 0, kind: input, shape index: {}]   ;;  %s1950_s1 = inlined_call_operand.hbm [shape: f32[8,8,192], index: 1, kind: input, shape index: {}]   ;;  %s1951_s2 = inlined_call_operand.hbm [shape: f32[64,192], index: 2, kind: input, shape index: {}]   ;;  %s1952_s3 = inlined_call_operand.vmem [shape: f32[1,64], index: 3, kind: input, shape index: {}]   ;;  %s1953_s4 = inlined_call_operand.vmem [shape: f32[64,32], index: 4, kind: input, shape index: {}]   ;;  %s1954_s5 = inlined_call_operand.vmem [shape: f32[1,32], index: 5, kind: input, shape index: {}]   ;;  %s1955_s6 = inlined_call_operand.hbm [shape: f32[8,8,32], index: 6, kind: output, shape index: {0}]   ;;  %s1956_s7 = inlined_call_operand.hbm [shape: f32[8,8,32], index: 7, kind: output, shape index: {1}]   ;;  %s1957_s8 = inlined_call_operand.hbm [shape: f32[8,32], index: 8, kind: output, shape index: {2}]  }
   0x1   :  { %1968 = sst [smem:[#allocation26_spill]] %s1950_s1  ;;  %s15_s29 = sshll.u32 %s1949_s0, 4  ;;  %s16_s29 = int_to_ptr.vmem [resolvable:$true] %s15_s29 }
   0x2   :  { %1969 = sst [smem:[#allocation27_spill]] %s1951_s2 }
   0x3   :  { %1970 = sst [smem:[#allocation28_spill]] %s1952_s3 }
   0x4   :  { %1971 = sst [smem:[#allocation29_spill]] %s1953_s4 }
   0x5   :  { %1972 = sst [smem:[#allocation30_spill]] %s1955_s6 }
   0x6   :  { %1973 = sst [smem:[#allocation31_spill]] %s1957_s8 }
   0x7   :  { %18 = dma.vmem_to_smem %s16_s29, 16, %s1524_s30, [#allocation3] }
   0x8   :  { %1466 = dma.done.wait [#allocation3], 16 }
   0x9   :  { %1467 = vsyncadd [#allocation3], 4294967280 }
   0xa   :  { %21 = sfence }
   0xb   :  { %22 = vsyncpa [#allocation6], 0 }
   0xc   :  { %24 = vsyncpa [#allocation6 + $0x1], 0 }
   0xd   :  { %25 = vsyncpa [#allocation9], 0 }
   0xe   :  { %26 = vsyncpa [#allocation7], 0 }
   0xf   :  { %28 = vsyncpa [#allocation7 + $0x1], 0 }
  0x10   :  { %29 = vsyncpa [#allocation12], 0 }
  0x11   :  { %31 = vsyncpa [#allocation12 + $0x1], 0  ;;  %s1583_s9 = smov 0   ;;  %s1585_s10 = smov 0  }
  0x12   :  { %s1587_s11 = smov 0   ;;  %s1589_s0 = smov 0  }
  0x13   :  { %s1591_s12 = smov 0   ;;  %s1593_s13 = smov 0  }
  0x14   :  { %s1595_s14 = smov 0   ;;  %s1597_s15 = smov 0  }
  0x15   :  { %s1599_s16 = smov 0  }
  0x16 LB: > { %1974 = sst [smem:[#allocation20_spill]] %s1502_s0  ;;  %s1627_s17 = sadd.s32 4294967295, %s1522_s16   ;;  %s1522_s16 = sphi %s1599_s16, %s37_s16   ;;  %s1518_s15 = sphi %s1597_s15, %s2011_s15   ;;  %s1514_s14 = sphi %s1595_s14, %s2010_s14   ;;  %s1510_s13 = sphi %s1593_s13, %s2009_s13   ;;  %s1506_s12 = sphi %s1591_s12, %s2008_s12   ;;  %s1502_s0 = sphi %s1589_s0, %s2007_s0   ;;  %s1498_s11 = sphi %s1587_s11, %s2006_s11   ;;  %s1494_s10 = sphi %s1585_s10, %s2005_s10   ;;  %s1490_s9 = sphi %s1583_s9, %s2004_s9  }
  0x17   : > { %s1958_s18 = sadd.s32 4294967294, %s1522_s16   ;;  %p71_p0 = scmp.ne.s32.totalorder %s1506_s12, %s1502_s0 }
  0x18   : > { %p72_p1 = scmp.eq.s32.totalorder %s1627_s17, 0  ;;  %p181_p2 = scmp.eq.s32.totalorder %s1627_s17, 1 }
  0x19   : > { %p187_p3 = scmp.eq.s32.totalorder %s1958_s18, 1  ;;  %p210_p5 = scmp.ne.s32.totalorder %s1498_s11, %s1494_s10 }
  0x1a   : > { %p1638_p4 = por %p72_p1, %p71_p0  ;;  %p216_p7 = scmp.ne.s32.totalorder %s1494_s10, %s1490_s9 }
  0x1b   : > { %p1644_p6 = por %p187_p3, %p71_p0  ;;  %p1651_p8 = por %p210_p5, %p181_p2 }
  0x1c   : > { %p1070_p9 = scmp.ge.s32.totalorder %s1522_s16, 1  ;;  %p1656_p10 = por %p216_p7, %p187_p3 }
  0x1d   : > { %s1976_s20 = scalar_select %p1644_p6, 1, 0 }
  0x1e   : > { %s1979_s22 = scalar_select %p1656_p10, 1, 0 }
  0x1f   : > { %1977 = sst [smem:[#allocation21_spill]] %s1976_s20  ;;  %p250_p11 = scmp.lt.s32.totalorder %s1522_s16, 3 }
  0x20   : > { %1980 = sst [smem:[#allocation22_spill]] %s1979_s22  ;;  %s1525_s27 = smov [#allocation8]  }
  0x21   : > { %s1981_s2 = sld [smem:[#allocation27_spill]]  ;;  %p1664_p12 = pnand %p1070_p9, %p250_p11 }
  0x22   : > { %s263_s28 = sshll.u32 %s1525_s27, 4  ;;  %s1959_s29 = smov 256   ;;  %s264_s28 = int_to_ptr.vmem [resolvable:$true] %s263_s28 }
  0x23   : > { %p1142_p13 = pneg %p1664_p12  ;;  %s1960_s30 = smov 16  }
  0x24   : > { %s46_s9 = sadd.s32 1, %s1518_s15  ;;  %s58_s23 = sadd.s32 1, %s1510_s13 }
  0x25   : > { %p1143_p0 = pnand %p1142_p13, %p72_p1  ;;  %p47_p5 = scmp.ge.s32.totalorder %s46_s9, 2 }
  0x26   : > { %p65_p7 = scmp.ne.s32.totalorder %s1510_s13, %s1506_s12  ;;  %p66_p9 = scmp.eq.s32.totalorder %s1522_s16, 0 }
  0x27   : > { %s261_s25 = sshll.u32 %s1981_s2, 4  ;;  %s2013_s9 = smov (%p47_p5, %s46_s9), 0  ;;  %s262_s25 = int_to_ptr.hbm [resolvable:$true] %s261_s25 }
  0x28   : > { %1145 = dma.hbm_to_vmem [thread:$0]  (!%p1143_p0), %s262_s25, 2048, %s264_s28, [#allocation9], %s1959_s29, %s1959_s29, %s1960_s30  }
  0x29   : > { %1983 = sst [smem:[#allocation23_spill]] %s2013_s9  ;;  %p1685_p11 = por %p181_p2, %p65_p7 }
  0x2a   : > { %s53_s27 = ssub.s32 %s1518_s15, %s2013_s9  ;;  %s193_s25 = ssub.s32 1, %s1518_s15 }
  0x2b   : > { %s1984_s24 = scalar_select %p1685_p11, 1, 0 }
  0x2c   : > { %p56_p13 = scmp.eq.s32.totalorder %s53_s27, 0  ;;  %s194_s28 = ssub.s32 1, %s2013_s9 }
  0x2d   : > { %1985 = sst [smem:[#allocation24_spill]] %s1984_s24  ;;  %s195_s18 = ssub.s32 %s193_s25, %s194_s28 }
  0x2e   : > { %s200_s29 = sadd.s32 1, %s1498_s11  ;;  %p1697_p0 = por %p66_p9, %p65_p7 }
  0x2f   : > { %s1695_s30 = scalar_select %p56_p13, %s1510_s13, %s58_s23  }
  0x30   : > { %p198_p5 = scmp.eq.s32.totalorder %s195_s18, 0  ;;  %s286_s22 = sand.u32 1, %s1510_s13  }
  0x31   : > { %1986 = sst [smem:[#allocation25_spill]] %s1695_s30  ;;  %s1125_s20 = sshll.u32 %s1518_s15, 6 }
  0x32   : > { %s1704_s0 = scalar_select %p198_p5, %s1498_s11, %s200_s29  }
  0x33   : > { %p1158_p3 = scmp.lt.s32.totalorder %s1522_s16, 2  ;;  %s1073_s8 = sshll.u32 %s286_s22, 6 }
  0x34   : > { %s1988_s1 = sld [smem:[#allocation26_spill]]  ;;  %s290_s28 = scalar_lea.vmem [#allocation5], %s1073_s8 }
  0x35   : > { %s301_s23 = sshll.u32 %s290_s28, 4  ;;  %p1147_p7 = pnand %p1158_p3, %p1697_p0  ;;  %s302_s23 = int_to_ptr.vmem [resolvable:$true] %s301_s23 }
  0x36   : > { %s287_s9 = scalar_lea.sflag [#allocation6], %s286_s22  ;;  %s1989_s30 = smov 16  }
  0x37   : > { %s1990_s18 = smov 256   ;;  %s1718_s29 = sand.u32 (!%p1664_p12), 1, %s1506_s12  }
  0x38   : > { %313 = sbr.rel (%p1664_p12) target bundleno = 1965 (0x7ad), region = 40  ;;  %s1078_s6 = sshll.u32 (!%p1664_p12), %s1718_s29, 6 }
  0x39   : > { %s316_s8 = scalar_lea.sflag (!%p1664_p12), [#allocation6], %s1718_s29 }
  0x3a   : > { %s298_s27 = scalar_lea.hbm %s1988_s1, %s1125_s20  ;;  %s1722_s20 = scalar_lea.vmem (!%p1664_p12), [#allocation5], %s1078_s6 }
  0x3b   : > { %s299_s25 = sshll.u32 %s298_s27, 4  ;;  %s300_s25 = int_to_ptr.hbm [resolvable:$true] %s299_s25 }
  0x3c   : > { %1149 = dma.hbm_to_vmem [thread:$0]  (!%p1147_p7), %s300_s25, 1024, %s302_s23, %s287_s9, %s1990_s18, %s1990_s18, %s1989_s30  }
  0x3d   : > { %1469 = dma.done.wait (%p1638_p4), %s316_s8, 1024  }
  0x3e   : > { %1471 = vsyncadd (%p1638_p4), %s316_s8, 4294966272 }
  0x3f   : > { %1473 = dma.done.wait (%p72_p1), [#allocation9], 2048  }
  0x40   : > { %1475 = vsyncadd (%p72_p1), [#allocation9], 4294965248  ;;  %s1080_s2 = sshll.u32 %s1718_s29, 5  ;;  %s356_s22 = sand.u32 1, %s1494_s10  }
  0x41   : > { %s1081_s26 = sshll.u32 %s356_s22, 5  ;;  %s1734_s30 = scalar_lea.vmem [#allocation10], %s1080_s2 }
  0x42   : > { %s1736_s9 = scalar_lea.vmem [#allocation11], %s1081_s26  ;;  %p1082_p12 = scmp.ne.s32.totalorder %s1514_s14, 0 }
  0x44   : > { %368 = sbr.rel (%p1082_p12) target bundleno = 75 (0x4b), region = 52 }
  0x49   : > { %vm369_vm0 = vcmask 523264   ;;  %v1528_v0 = vmov 0.0  }
  0x4a   : > { %370 = vst.msk [vmem:[#allocation2] sm:$0xff] %vm369_vm0, %v1528_v0 }
  0x4b PF: > { %v385_v1 = vld [vmem:[#allocation8 + $0x70] sm:$0xff]  ;;  %v383_v2 = vld [vmem:[#allocation8 + $0x60] sm:$0xff]  ;;  %v386_v4 = vld [vmem:[#allocation8 + $0x78] sm:$0xff]  ;;  %vm409_vm1 = vcmask 523264   ;;  %s1991_s3 = sld [smem:[#allocation28_spill]]  ;;  %s1529_s27 = smov 64   ;;  %v388_v47 = vlaneseq }
  0x4c   : > { %421 = vmatpush.msra.mxu0 %v385_v1  ;;  %531 = vmatpush.msra.mxu2 %v385_v1  ;;  %v381_v3 = vld [vmem:[#allocation8 + $0x50] sm:$0xff]  ;;  %v384_v5 = vld [vmem:[#allocation8 + $0x68] sm:$0xff]  ;;  %v379_v6 = vld [vmem:[#allocation8 + $0x40] sm:$0xff]  ;;  %s1758_s25 = sshll.u32 %s1514_s14, 2  ;;  %v1530_v53 = vmov 0.0   ;;  %vm496_vm8 = vcmask 261120  }
  0x4d   : > { %441 = vmatpush.msra.mxu1 %v386_v4  ;;  %551 = vmatpush.msra.mxu3 %v386_v4  ;;  %v382_v7 = vld [vmem:[#allocation8 + $0x58] sm:$0xff]  ;;  %v377_v8 = vld [vmem:[#allocation8 + $0x30] sm:$0xff]  ;;  %v380_v9 = vld [vmem:[#allocation8 + $0x48] sm:$0xff]  ;;  %s398_s28 = ssub.s32 7, %s1758_s25  ;;  %s401_s23 = sld [smem:[#allocation4 + %s1758_s25]]  ;;  %v1762_v48 = vand.u32 127, %v388_v47 }
  0x4e   : > { %422 = vmatpush.msra.mxu0 %v383_v2  ;;  %532 = vmatpush.msra.mxu2 %v383_v2  ;;  %v375_v10 = vld [vmem:[#allocation8 + $0x20] sm:$0xff]  ;;  %v378_v11 = vld [vmem:[#allocation8 + $0x38] sm:$0xff]  ;;  %v373_v12 = vld [vmem:[#allocation8 + $0x10] sm:$0xff]  ;;  %s402_s18 = sld [smem:[#allocation4 + %s398_s28]]  ;;  %v1765_v51 = vshrl.u32 %v388_v47, 7  ;;  %s507_s6 = sadd.s32 1, %s1758_s25 }
  0x4f   : > { %442 = vmatpush.msra.mxu1 %v384_v5  ;;  %552 = vmatpush.msra.mxu3 %v384_v5  ;;  %v376_v13 = vld [vmem:[#allocation8 + $0x28] sm:$0xff]  ;;  %v371_v14 = vld [vmem:[#allocation8] sm:$0xff]  ;;  %v374_v16 = vld [vmem:[#allocation8 + $0x18] sm:$0xff]  ;;  %vm396_vm6 = vcmp.lt.s32.totalorder %v1762_v48, 32  ;;  %s508_s8 = ssub.s32 6, %s1758_s25  ;;  %s512_s2 = sld [smem:[#allocation4 + %s507_s6]] }
  0x50   : > { %423 = vmatpush.msra.mxu0 %v381_v3  ;;  %533 = vmatpush.msra.mxu2 %v381_v3  ;;  %v372_v17 = vld [vmem:[#allocation8 + $0x8] sm:$0xff]  ;;  %v399_v18 = vld [vmem:[%s1722_s20] sm:$0xff]  ;;  %v1089_v60 = vld [vmem:[%s1722_s20 + $0x10] sm:$0xff]  ;;  %s513_s22 = sld [smem:[#allocation4 + %s508_s8]]  ;;  %s614_s26 = sadd.s32 2, %s1758_s25 }
  0x51   : > { %443 = vmatpush.msra.mxu1 %v382_v7  ;;  %553 = vmatpush.msra.mxu3 %v382_v7  ;;  %v1739_v15 = vld [vmem:[#allocation2] sm:$0xff]  ;;  %v400_v36 = vld [vmem:[%s1722_s20 + $0x8] sm:$0xff]  ;;  %s615_s19 = ssub.s32 5, %s1758_s25  ;;  %s619_s24 = sld [smem:[#allocation4 + %s614_s26]] }
  0x52   : > { %424 = vmatpush.msra.mxu0 %v379_v6  ;;  %534 = vmatpush.msra.mxu2 %v379_v6  ;;  %v1749_v27 = vld [vmem:[%s1991_s3] ss:$0 sm:$0xff]  ;;  %s620_s28 = sld [smem:[#allocation4 + %s615_s19]]  ;;  %p1112_p1 = scmp.ne.s32.totalorder %s1514_s14, 1 }
  0x53   : > { %444 = vmatpush.msra.mxu1 %v380_v9  ;;  %554 = vmatpush.msra.mxu3 %v380_v9  ;;  %v403_v49 = vstv %s401_s23  ;;  %s1531_s23 = smov 96   ;;  %s1992_s4 = sld [smem:[#allocation29_spill]] (!%p1112_p1) }
  0x54   : > { %425 = vmatpush.msra.mxu0 %v377_v8  ;;  %535 = vmatpush.msra.mxu2 %v377_v8  ;;  %v404_v50 = vstv %s402_s18  ;;  %s722_s18 = ssub.s32 4, %s1758_s25 }
  0x55   : > { %445 = vmatpush.msra.mxu1 %v378_v11  ;;  %555 = vmatpush.msra.mxu3 %v378_v11  ;;  %v405_v52 = vsel %vm396_vm6, %v403_v49, %v404_v50  ;;  %s727_s8 = sld [smem:[#allocation4 + %s722_s18]] }
  0x56   : > { %426 = vmatpush.msra.mxu0 %v375_v10  ;;  %536 = vmatpush.msra.mxu2 %v375_v10  ;;  %vm406_vm7 = vcmp.lt.s32.totalorder %v1765_v51, %v405_v52 }
  0x57   : > { %446 = vmatpush.msra.mxu1 %v376_v13  ;;  %556 = vmatpush.msra.mxu3 %v376_v13  ;;  %v1084_v54 = vsel %vm406_vm7, 1.0, %v1530_v53 }
  0x58   : > { %427 = vmatpush.msra.mxu0 %v373_v12  ;;  %537 = vmatpush.msra.mxu2 %v373_v12  ;;  %v504_v55 = vsub.f32 1.0, %v1084_v54 }
  0x59   : > { %447 = vmatpush.msra.mxu1 %v374_v16  ;;  %557 = vmatpush.msra.mxu3 %v374_v16 }
  0x5a   : > { %428 = vmatpush.msra.mxu0 %v371_v14  ;;  %538 = vmatpush.msra.mxu2 %v371_v14  ;;  %v505_v56 = vmul.f32 %v504_v55, %v1739_v15 }
  0x5b   : > { %1085 = vmatmul.msk.f32.vlgmr.msra.gmra.mxu0 %vm409_vm1, %v1739_v15  ;;  %448 = vmatpush.msra.mxu1 %v372_v17 }
  0x5c   : > { %638 = vmatpush.msrb.mxu0 %v385_v1  ;;  %745 = vmatpush.msrb.mxu2 %v385_v1 }
  0x5d   : > { %1086 = vmatmul.msk.f32.vlgmr.msra.gmra.mxu1 %vm409_vm1, %v1739_v15  ;;  %558 = vmatpush.msra.mxu3 %v372_v17 }
  0x5e   : > { %658 = vmatpush.msrb.mxu1 %v386_v4  ;;  %639 = vmatpush.msrb.mxu0 %v383_v2 }
  0x5f   : > { %765 = vmatpush.msrb.mxu3 %v386_v4  ;;  %746 = vmatpush.msrb.mxu2 %v383_v2 }
  0x60   : > { %659 = vmatpush.msrb.mxu1 %v384_v5  ;;  %640 = vmatpush.msrb.mxu0 %v381_v3 }
  0x61   : > { %766 = vmatpush.msrb.mxu3 %v384_v5  ;;  %747 = vmatpush.msrb.mxu2 %v381_v3 }
  0x62   : > { %660 = vmatpush.msrb.mxu1 %v382_v7  ;;  %641 = vmatpush.msrb.mxu0 %v379_v6 }
  0x63   : > { %767 = vmatpush.msrb.mxu3 %v382_v7  ;;  %748 = vmatpush.msrb.mxu2 %v379_v6 }
  0x64   : > { %661 = vmatpush.msrb.mxu1 %v380_v9  ;;  %642 = vmatpush.msrb.mxu0 %v377_v8 }
  0x65   : > { %768 = vmatpush.msrb.mxu3 %v380_v9  ;;  %749 = vmatpush.msrb.mxu2 %v377_v8 }
  0x66   : > { %662 = vmatpush.msrb.mxu1 %v378_v11  ;;  %643 = vmatpush.msrb.mxu0 %v375_v10 }
  0x67   : > { %769 = vmatpush.msrb.mxu3 %v378_v11  ;;  %750 = vmatpush.msrb.mxu2 %v375_v10 }
  0x68   : > { %663 = vmatpush.msrb.mxu1 %v376_v13  ;;  %644 = vmatpush.msrb.mxu0 %v373_v12 }
  0x69   : > { %770 = vmatpush.msrb.mxu3 %v376_v13  ;;  %751 = vmatpush.msrb.mxu2 %v373_v12  ;;  %v1090_v13 = vld [vmem:[%s1722_s20 + $0x18] sm:$0xff] }
  0x6a   : > { %664 = vmatpush.msrb.mxu1 %v374_v16  ;;  %645 = vmatpush.msrb.mxu0 %v371_v14 }
  0x6b   : > { %771 = vmatpush.msrb.mxu3 %v374_v16  ;;  %752 = vmatpush.msrb.mxu2 %v371_v14 }
  0x6c   : > { %665 = vmatpush.msrb.mxu1 %v372_v17 }
  0x6d   : > { %772 = vmatpush.msrb.mxu3 %v372_v17 }
  0xd8   : > { %v430_v19 = vpop.f32.mrf.mxu0 }
  0xd9   : > { %v453_v20 = vadd.f32 %v430_v19, %v399_v18 }
  0xda   : > { %v450_v28 = vpop.f32.mrf.mxu1 }
  0xdb   : > { %v1087_v21 = vmul.f32 -1.442695, %v453_v20  ;;  %v476_v33 = vadd.f32 %v1749_v27, %v450_v28 }
  0xdd   : > { %1247 = vpow2.f32 %v1087_v21 }
  0xe3   : > { %v1248_v22 = vpop.eup %1247 }
  0xe4   : > { %v457_v23 = vadd.f32 1.0, %v1248_v22 }
  0xe6   : > { %1249 = vrcp.f32 %v457_v23  ;;  %v469_v29 = vand.u32 2147483648, %v457_v23  ;;  %v467_v31 = vand.u32 2147483647, %v457_v23  ;;  %vm463_vm3 = vweird.f32 %v457_v23 }
  0xe8   : > { %v470_v34 = vor.u32 1.1754944e-38, %v469_v29  ;;  %vm468_vm5 = vcmp.eq.f32.partialorder %v467_v31, 8.507059e+37 }
  0xec   : > { %v1250_v24 = vpop.eup %1249 }
  0xed   : > { %v459_v25 = vmul.f32 %v1250_v24, %v457_v23  ;;  %vm464_vm2 = vweird.f32 %v1250_v24 }
  0xee   : > { %vm465_vm4 = vmor %vm463_vm3, %vm464_vm2 }
  0xef   : > { %v460_v26 = vsub.f32 1.0, %v459_v25  ;;  %v515_v25 = vstv %s513_s22 }
  0xf1   : > { %v461_v30 = vmul.f32 %v1250_v24, %v460_v26 }
  0xf3   : > { %v462_v32 = vadd.f32 %v1250_v24, %v461_v30 }
  0xf5   : > { %v466_v35 = vsel %vm465_vm4, %v1250_v24, %v462_v32  ;;  %v514_v24 = vstv %s512_s2 }
  0xf6   : > { %v471_v37 = vsel %vm468_vm5, %v470_v34, %v466_v35  ;;  %v516_v26 = vsel %vm396_vm6, %v514_v24, %v515_v25  ;;  %v1097_v34 = vld [vmem:[%s1722_s20 + $0x20] sm:$0xff] }
  0xf7   : > { %v477_v38 = vmul.f32 %v476_v33, %v471_v37  ;;  %v480_v42 = vsub.f32 1.0, %v471_v37  ;;  %vm517_vm13 = vcmp.lt.s32.totalorder %v1765_v51, %v516_v26 }
  0xf8   : > { %v1091_v28 = vsel %vm517_vm13, 1.0, %v1530_v53 }
  0xf9   : > { %v478_v39 = vadd.f32 %v477_v38, %v400_v36  ;;  %v611_v29 = vsub.f32 1.0, %v1091_v28 }
  0xfb   : > { %1251 = vtanh.f32 %v478_v39 }
 0x101   : > { %v1252_v40 = vpop.eup %1251 }
 0x102   : > { %482 = vrot.lane.b32.xlu0 %v1252_v40, %s1529_s27 }
 0x10a   : > { %486 = vrot.lane.b32.xlu0 %v1739_v15, %s1529_s27 }
 0x174   : > { %v483_v41 = vpop.permute.xlu0 %482 }
 0x175   : > { %v485_v44 = vmul.f32 %v483_v41, %v480_v42 }
 0x17c   : > { %v487_v43 = vpop.permute.xlu0 %486 }
 0x17d   : > { %v489_v45 = vmul.f32 %v487_v43, %v471_v37 }
 0x17f   : > { %v490_v46 = vadd.f32 %v489_v45, %v485_v44 }
 0x181   : > { %492 = vrot.lane.b32.xlu1 %v490_v46, %s1529_s27 }
 0x1f3   : > { %v493_v57 = vpop.permute.xlu1 %492 }
 0x1f4   : > { %v1772_v58 = vmul.f32 %v1084_v54, %v493_v57  ;;  %v1098_v54 = vld [vmem:[%s1722_s20 + $0x28] sm:$0xff] }
 0x1f6   : > { %497 = vst.msk [vmem:[%s1734_s30] sm:$0xff] %vm496_vm8, %v1772_v58  ;;  %v506_v59 = vadd.f32 %v505_v56, %v1772_v58 }
 0x1f8   : > { %593 = vrot.lane.b32.xlu2 %v506_v59, %s1529_s27  ;;  %1092 = vmatmul.msk.f32.vlgmr.msra.gmra.mxu2 %vm409_vm1, %v506_v59  ;;  %v612_v31 = vmul.f32 %v611_v29, %v506_v59 }
 0x1f9   : > { %1093 = vmatmul.msk.f32.vlgmr.msra.gmra.mxu3 %vm409_vm1, %v506_v59 }
 0x252   : > { %v594_v19 = vpop.permute.xlu2 %593 }
 0x27b   : > { %v540_v61 = vpop.f32.mrf.mxu2 }
 0x27c   : > { %v563_v62 = vadd.f32 %v1089_v60, %v540_v61  ;;  %v560_v8 = vpop.f32.mrf.mxu3 }
 0x27d   : > { %v583_v12 = vadd.f32 %v1749_v27, %v560_v8 }
 0x27e   : > { %v1094_v63 = vmul.f32 -1.442695, %v563_v62 }
 0x280   : > { %1253 = vpow2.f32 %v1094_v63 }
 0x286   : > { %v1254_v0 = vpop.eup %1253 }
 0x287   : > { %v567_v1 = vadd.f32 1.0, %v1254_v0 }
 0x289   : > { %1255 = vrcp.f32 %v567_v1  ;;  %v579_v5 = vand.u32 2147483648, %v567_v1  ;;  %v577_v7 = vand.u32 2147483647, %v567_v1  ;;  %vm573_vm10 = vweird.f32 %v567_v1 }
 0x28b   : > { %v580_v10 = vor.u32 1.1754944e-38, %v579_v5  ;;  %vm578_vm12 = vcmp.eq.f32.partialorder %v577_v7, 8.507059e+37 }
 0x28f   : > { %v1256_v2 = vpop.eup %1255 }
 0x290   : > { %v569_v3 = vmul.f32 %v1256_v2, %v567_v1  ;;  %vm574_vm9 = vweird.f32 %v1256_v2 }
 0x291   : > { %vm575_vm11 = vmor %vm573_vm10, %vm574_vm9 }
 0x292   : > { %v570_v4 = vsub.f32 1.0, %v569_v3  ;;  %v622_v3 = vstv %s620_s28 }
 0x294   : > { %v571_v6 = vmul.f32 %v1256_v2, %v570_v4 }
 0x296   : > { %v572_v9 = vadd.f32 %v1256_v2, %v571_v6 }
 0x298   : > { %v576_v11 = vsel %vm575_vm11, %v1256_v2, %v572_v9  ;;  %v621_v2 = vstv %s619_s24 }
 0x299   : > { %v581_v14 = vsel %vm578_vm12, %v580_v10, %v576_v11  ;;  %v623_v4 = vsel %vm396_vm6, %v621_v2, %v622_v3 }
 0x29a   : > { %v584_v15 = vmul.f32 %v583_v12, %v581_v14  ;;  %v587_v18 = vsub.f32 1.0, %v581_v14  ;;  %v596_v21 = vmul.f32 %v594_v19, %v581_v14  ;;  %vm624_vm3 = vcmp.lt.s32.totalorder %v1765_v51, %v623_v4 }
 0x29b   : > { %v1099_v5 = vsel %vm624_vm3, 1.0, %v1530_v53 }
 0x29c   : > { %v585_v16 = vadd.f32 %v1090_v13, %v584_v15  ;;  %v718_v6 = vsub.f32 1.0, %v1099_v5  ;;  %v1105_v13 = vld [vmem:[%s1722_s20 + $0x30] sm:$0xff] }
 0x29e   : > { %1257 = vtanh.f32 %v585_v16 }
 0x2a4   : > { %v1258_v17 = vpop.eup %1257 }
 0x2a5   : > { %589 = vrot.lane.b32.xlu1 %v1258_v17, %s1529_s27 }
 0x317   : > { %v590_v20 = vpop.permute.xlu1 %589 }
 0x318   : > { %v592_v22 = vmul.f32 %v590_v20, %v587_v18 }
 0x31a   : > { %v597_v23 = vadd.f32 %v596_v21, %v592_v22 }
 0x31c   : > { %599 = vrot.lane.b32.xlu2 %v597_v23, %s1529_s27 }
 0x376   : > { %v600_v30 = vpop.permute.xlu2 %599 }
 0x377   : > { %v602_v32 = vmul.f32 %v1091_v28, %v600_v30 }
 0x379   : > { %1095 = vst.msk [vmem:[%s1734_s30 + $0x8] sm:$0xff] %vm496_vm8, %v602_v32  ;;  %v613_v33 = vadd.f32 %v612_v31, %v602_v32  ;;  %v1106_v31 = vld [vmem:[%s1722_s20 + $0x38] sm:$0xff]  ;;  %s721_s20 = sadd.s32 3, %s1758_s25 }
 0x37a   : > { %s726_s6 = sld [smem:[#allocation4 + %s721_s20]] }
 0x37b   : > { %700 = vrot.lane.b32.xlu1 %v613_v33, %s1529_s27  ;;  %1100 = vmatmul.msk.f32.vlgmr.msrb.gmra.mxu0 %vm409_vm1, %v613_v33  ;;  %v719_v8 = vmul.f32 %v718_v6, %v613_v33 }
 0x37c   : > { %1101 = vmatmul.msk.f32.vlgmr.msrb.gmra.mxu1 %vm409_vm1, %v613_v33 }
 0x3ed   : > { %v701_v61 = vpop.permute.xlu1 %700 }
 0x3f8   : > { %v647_v35 = vpop.f32.mrf.mxu0 }
 0x3f9   : > { %v670_v36 = vadd.f32 %v1097_v34, %v647_v35  ;;  %v667_v46 = vpop.f32.mrf.mxu1 }
 0x3fa   : > { %v690_v52 = vadd.f32 %v1749_v27, %v667_v46 }
 0x3fb   : > { %v1102_v37 = vmul.f32 -1.442695, %v670_v36 }
 0x3fd   : > { %1259 = vpow2.f32 %v1102_v37 }
 0x403   : > { %v1260_v38 = vpop.eup %1259 }
 0x404   : > { %v674_v39 = vadd.f32 1.0, %v1260_v38 }
 0x406   : > { %1261 = vrcp.f32 %v674_v39  ;;  %v686_v43 = vand.u32 2147483648, %v674_v39  ;;  %v684_v45 = vand.u32 2147483647, %v674_v39  ;;  %vm680_vm15 = vweird.f32 %v674_v39 }
 0x408   : > { %v687_v49 = vor.u32 1.1754944e-38, %v686_v43  ;;  %vm685_vm2 = vcmp.eq.f32.partialorder %v684_v45, 8.507059e+37 }
 0x40c   : > { %v1262_v40 = vpop.eup %1261 }
 0x40d   : > { %v676_v41 = vmul.f32 %v1262_v40, %v674_v39  ;;  %vm681_vm14 = vweird.f32 %v1262_v40 }
 0x40e   : > { %vm682_vm0 = vmor %vm680_vm15, %vm681_vm14 }
 0x40f   : > { %v677_v42 = vsub.f32 1.0, %v676_v41  ;;  %v728_v41 = vstv %s726_s6 }
 0x411   : > { %v678_v44 = vmul.f32 %v1262_v40, %v677_v42 }
 0x413   : > { %v679_v47 = vadd.f32 %v1262_v40, %v678_v44 }
 0x415   : > { %v683_v50 = vsel %vm682_vm0, %v1262_v40, %v679_v47 }
 0x416   : > { %v688_v55 = vsel %vm685_vm2, %v687_v49, %v683_v50 }
 0x417   : > { %v691_v56 = vmul.f32 %v690_v52, %v688_v55  ;;  %v694_v60 = vsub.f32 1.0, %v688_v55  ;;  %v703_v63 = vmul.f32 %v701_v61, %v688_v55 }
 0x419   : > { %v692_v57 = vadd.f32 %v1098_v54, %v691_v56 }
 0x41b   : > { %1263 = vtanh.f32 %v692_v57 }
 0x421   : > { %v1264_v59 = vpop.eup %1263 }
 0x422   : > { %696 = vrot.lane.b32.xlu0 %v1264_v59, %s1529_s27 }
 0x494   : > { %v697_v62 = vpop.permute.xlu0 %696 }
 0x495   : > { %v699_v0 = vmul.f32 %v697_v62, %v694_v60 }
 0x497   : > { %v704_v1 = vadd.f32 %v703_v63, %v699_v0 }
 0x499   : > { %706 = vrot.lane.b32.xlu2 %v704_v1, %s1529_s27 }
 0x4f3   : > { %v707_v7 = vpop.permute.xlu2 %706 }
 0x4f4   : > { %v709_v9 = vmul.f32 %v1099_v5, %v707_v7 }
 0x4f6   : > { %1103 = vst.msk [vmem:[%s1734_s30 + $0x10] sm:$0xff] %vm496_vm8, %v709_v9  ;;  %v720_v10 = vadd.f32 %v719_v8, %v709_v9 }
 0x4f8   : > { %807 = vrot.lane.b32.xlu1 %v720_v10, %s1529_s27  ;;  %1108 = vmatmul.msk.f32.vlgmr.msrb.gmra.mxu2 %vm409_vm1, %v720_v10 }
 0x4f9   : > { %1109 = vmatmul.msk.f32.vlgmr.msrb.gmra.mxu3 %vm409_vm1, %v720_v10 }
 0x500   : > { %606 = vrot.lane.b32.xlu1 %v602_v32, %s1531_s23 }
 0x56a   : > { %v808_v11 = vpop.permute.xlu1 %807 }
 0x572   : > { %v607_v12 = vpop.permute.xlu1 %606 }
 0x573   : > { %1096 = vst.msk [vmem:[%s1736_s9 + $0x10] sm:$0xff] %vm496_vm8, %v607_v12 }
 0x57b   : > { %v754_v14 = vpop.f32.mrf.mxu2 }
 0x57c   : > { %v777_v15 = vadd.f32 %v1105_v13, %v754_v14  ;;  %v774_v25 = vpop.f32.mrf.mxu3 }
 0x57d   : > { %v797_v30 = vadd.f32 %v1749_v27, %v774_v25 }
 0x57e   : > { %v1110_v16 = vmul.f32 -1.442695, %v777_v15 }
 0x580   : > { %1265 = vpow2.f32 %v1110_v16 }
 0x586   : > { %v1266_v17 = vpop.eup %1265 }
 0x587   : > { %v781_v18 = vadd.f32 1.0, %v1266_v17 }
 0x589   : > { %1267 = vrcp.f32 %v781_v18  ;;  %v793_v22 = vand.u32 2147483648, %v781_v18  ;;  %v791_v24 = vand.u32 2147483647, %v781_v18  ;;  %vm787_vm5 = vweird.f32 %v781_v18 }
 0x58b   : > { %v794_v28 = vor.u32 1.1754944e-38, %v793_v22  ;;  %vm792_vm9 = vcmp.eq.f32.partialorder %v791_v24, 8.507059e+37 }
 0x58f   : > { %v1268_v19 = vpop.eup %1267 }
 0x590   : > { %v783_v20 = vmul.f32 %v1268_v19, %v781_v18  ;;  %vm788_vm4 = vweird.f32 %v1268_v19 }
 0x591   : > { %vm789_vm7 = vmor %vm787_vm5, %vm788_vm4 }
 0x592   : > { %v784_v21 = vsub.f32 1.0, %v783_v20 }
 0x594   : > { %v785_v23 = vmul.f32 %v1268_v19, %v784_v21 }
 0x596   : > { %v786_v26 = vadd.f32 %v1268_v19, %v785_v23 }
 0x598   : > { %v790_v29 = vsel %vm789_vm7, %v1268_v19, %v786_v26 }
 0x599   : > { %v795_v32 = vsel %vm792_vm9, %v794_v28, %v790_v29 }
 0x59a   : > { %v798_v33 = vmul.f32 %v797_v30, %v795_v32  ;;  %v810_v34 = vmul.f32 %v808_v11, %v795_v32  ;;  %v801_v37 = vsub.f32 1.0, %v795_v32 }
 0x59c   : > { %v799_v35 = vadd.f32 %v1106_v31, %v798_v33 }
 0x59e   : > { %1269 = vtanh.f32 %v799_v35 }
 0x5a4   : > { %v1270_v36 = vpop.eup %1269 }
 0x5a5   : > { %803 = vrot.lane.b32.xlu0 %v1270_v36, %s1529_s27 }
 0x5ad   : > { %499 = vrot.lane.b32.xlu0 %v1772_v58, %s1531_s23  ;;  %v729_v58 = vstv %s727_s8 }
 0x5ae   : > { %v730_v42 = vsel %vm396_vm6, %v728_v41, %v729_v58 }
 0x5af   : > { %vm731_vm10 = vcmp.lt.s32.totalorder %v1765_v51, %v730_v42 }
 0x5b0   : > { %v1107_v43 = vsel %vm731_vm10, 1.0, %v1530_v53 }
 0x5b1   : > { %v824_v44 = vsub.f32 1.0, %v1107_v43 }
 0x5b3   : > { %v825_v46 = vmul.f32 %v824_v44, %v720_v10 }
 0x617   : > { %v804_v38 = vpop.permute.xlu0 %803 }
 0x618   : > { %v806_v39 = vmul.f32 %v804_v38, %v801_v37 }
 0x61a   : > { %v811_v40 = vadd.f32 %v810_v34, %v806_v39 }
 0x61c   : > { %813 = vrot.lane.b32.xlu2 %v811_v40, %s1529_s27 }
 0x61f   : > { %v500_v27 = vpop.permute.xlu0 %499 }
 0x620   : > { %1088 = vst.msk [vmem:[%s1736_s9 + $0x18] sm:$0xff] %vm496_vm8, %v500_v27 }
 0x624   : > { %713 = vrot.lane.b32.xlu2 %v709_v9, %s1531_s23 }
 0x676   : > { %v814_v45 = vpop.permute.xlu2 %813 }
 0x677   : > { %v816_v47 = vmul.f32 %v1107_v43, %v814_v45 }
 0x679   : > { %1111 = vst.msk [vmem:[%s1734_s30 + $0x18] sm:$0xff] %vm496_vm8, %v816_v47  ;;  %v826_v49 = vadd.f32 %v825_v46, %v816_v47  ;;  %820 = vrot.lane.b32.xlu0 %v816_v47, %s1531_s23 }
 0x67b   : > { %827 = vst.msk [vmem:[#allocation2] sm:$0xff] %vm409_vm1, %v826_v49 }
 0x67e   : > { %v714_v50 = vpop.permute.xlu2 %713 }
 0x67f   : > { %1104 = vst.msk [vmem:[%s1736_s9 + $0x8] sm:$0xff] %vm496_vm8, %v714_v50 }
 0x6e8   : > { %831 = sbr.rel (%p1112_p1) target bundleno = 1925 (0x785), region = 56 }
 0x6eb   : > { %v821_v48 = vpop.permute.xlu0 %820 }
 0x6ec   : > { %823 = vst.msk [vmem:[%s1736_s9] sm:$0xff] %vm496_vm8, %v821_v48 }
 0x6ed   : > { %v839_v51 = vld [vmem:[%s1992_s4 + $0x38] sm:$0xff]  ;;  %v838_v53 = vld [vmem:[%s1992_s4 + $0x30] sm:$0xff]  ;;  %v837_v52 = vld [vmem:[%s1992_s4 + $0x28] sm:$0xff] }
 0x6ee   : > { %855 = vmatpush.msra.mxu0 %v839_v51  ;;  %v836_v54 = vld [vmem:[%s1992_s4 + $0x20] sm:$0xff]  ;;  %v835_v55 = vld [vmem:[%s1992_s4 + $0x18] sm:$0xff]  ;;  %v834_v56 = vld [vmem:[%s1992_s4 + $0x10] sm:$0xff] }
 0x6ef   : > { %v833_v57 = vld [vmem:[%s1992_s4 + $0x8] sm:$0xff]  ;;  %v832_v59 = vld [vmem:[%s1992_s4] sm:$0xff] }
 0x6f0   : > { %856 = vmatpush.msra.mxu0 %v838_v53  ;;  %v1271_v60 = vld [vmem:[%s1954_s5] ss:$0 sm:$0xff] }
 0x6f2   : > { %857 = vmatpush.msra.mxu0 %v837_v52 }
 0x6f4   : > { %858 = vmatpush.msra.mxu0 %v836_v54 }
 0x6f6   : > { %859 = vmatpush.msra.mxu0 %v835_v55 }
 0x6f8   : > { %860 = vmatpush.msra.mxu0 %v834_v56 }
 0x6fa   : > { %861 = vmatpush.msra.mxu0 %v833_v57 }
 0x6fc   : > { %862 = vmatpush.msra.mxu0 %v832_v59 }
 0x6fd   : > { %1113 = vmatmul.msk.f32.vlgmr.msra.gmra.mxu0 %vm409_vm1, %v826_v49 }
 0x77a   : > { %v864_v61 = vpop.f32.mrf.mxu0 }
 0x77b   : > { %v865_v62 = vadd.f32 %v1271_v60, %v864_v61 }
 0x77d   : > { %1272 = vtanh.f32 %v865_v62 }
 0x783   : > { %v1273_v63 = vpop.eup %1272 }
 0x784   : > { %868 = vst.msk [vmem:[#allocation13] sm:$0xff] %vm496_vm8, %v1273_v63 }
 0x785 PF: > { %s874_s19 = sand.u32 1, %s1627_s17   ;;  %s900_s24 = ssub.s32 1, %s1514_s14 }
 0x786   : > { %s907_s28 = sshll.u32 %s1736_s9, 4  ;;  %s1127_s23 = sshll.u32 %s900_s24, 5  ;;  %s908_s28 = int_to_ptr.vmem [resolvable:$true] %s907_s28 }
 0x787   : > { %s906_s6 = scalar_lea.hbm %s1956_s7, %s1127_s23  ;;  %s1126_s27 = sshll.u32 %s1514_s14, 5 }
 0x788   : > { %s909_s8 = sshll.u32 %s906_s6, 4  ;;  %s1993_s22 = sld [smem:[#allocation30_spill]]  ;;  %s910_s8 = int_to_ptr.hbm [resolvable:$true] %s909_s8 }
 0x789   : > { %s875_s1 = scalar_lea.sflag [#allocation12], %s874_s19  ;;  %s1360_s3 = sshra.s32 %s910_s8, 4  ;;  %s1361_s3 = int_to_ptr.hbm [resolvable:$true] %s1360_s3 }
 0x78a   : > { %s1362_s4 = scalar_lea.hbm %s1361_s3, 32  ;;  %s1366_s20 = scalar_lea.hbm %s1956_s7, 64 }
 0x78b   : > { %p1363_p4 = scmp.ne.s32.totalorder %s1361_s3, %s1362_s4  ;;  %p1367_p13 = scmp.lt.s32.totalorder %s1361_s3, %s1956_s7 }
 0x78c   : > { %p1368_p0 = scmp.lt.s32.totalorder %s1366_s20, %s1362_s4 }
 0x78d   : > { %p1364_p3 = pnand %p1363_p4, %p1651_p8 }
 0x78e   : > { %s887_s26 = scalar_lea.hbm %s1993_s22, %s1126_s27  ;;  %p1369_p5 = por %p1368_p0, %p1367_p13 }
 0x78f   : > { %p1365_p9 = pneg %p1364_p3 }
 0x791   : > { %p1370_p7 = pnand %p1369_p5, %p1365_p9 }
 0x793   : > { %1373 = shalt.err (!%p1370_p7)
}
 0x794   : > { %s1532_s14 = smov 128   ;;  %s1533_s6 = smov 8  }
 0x795   : > { %1135 = dma.vmem_to_hbm [thread:$0]  (%p1651_p8), %s908_s28, 512, %s910_s8, %s875_s1, %s1532_s14, %s1532_s14, %s1533_s6  }
 0x796   : > { %s888_s27 = sshll.u32 %s1734_s30, 4  ;;  %s890_s25 = sshll.u32 %s887_s26, 4  ;;  %s889_s27 = int_to_ptr.vmem [resolvable:$true] %s888_s27  ;;  %s891_s25 = int_to_ptr.hbm [resolvable:$true] %s890_s25 }
 0x797   : > { %s870_s2 = scalar_lea.sflag [#allocation7], %s1718_s29  ;;  %s1388_s9 = sshra.s32 %s891_s25, 4  ;;  %s1389_s9 = int_to_ptr.hbm [resolvable:$true] %s1388_s9 }
 0x798   : > { %s1390_s3 = scalar_lea.hbm %s1389_s9, 32  ;;  %s1394_s20 = scalar_lea.hbm %s1993_s22, 64 }
 0x799   : > { %p1391_p12 = scmp.ne.s32.totalorder %s1389_s9, %s1390_s3  ;;  %p1395_p8 = scmp.lt.s32.totalorder %s1389_s9, %s1993_s22 }
 0x79a   : > { %p1396_p3 = scmp.lt.s32.totalorder %s1394_s20, %s1390_s3 }
 0x79b   : > { %p1392_p1 = pnand %p1391_p12, %p1685_p11 }
 0x79c   : > { %p1397_p9 = por %p1396_p3, %p1395_p8 }
 0x79d   : > { %p1393_p4 = pneg %p1392_p1 }
 0x79f   : > { %p1398_p13 = pnand %p1397_p9, %p1393_p4 }
 0x7a1   : > { %1401 = shalt.err (!%p1398_p13)
}
 0x7a2   : > { %1134 = dma.vmem_to_hbm [thread:$0]  (%p1685_p11), %s889_s27, 512, %s891_s25, %s870_s2, %s1532_s14, %s1532_s14, %s1533_s6  }
 0x7a3   : > { %s1534_s1 = smov [#allocation13]   ;;  %s1995_s28 = sld [smem:[#allocation31_spill]] }
 0x7a4   : > { %s924_s21 = sshll.u32 %s1534_s1, 4  ;;  %s925_s21 = int_to_ptr.vmem [resolvable:$true] %s924_s21 }
 0x7a9   : > { %s926_s8 = sshll.u32 %s1995_s28, 4  ;;  %s927_s8 = int_to_ptr.hbm [resolvable:$true] %s926_s8 }
 0x7aa   : > { %1137 = dma.vmem_to_hbm [thread:$0]  (%p181_p2), %s925_s21, 128, %s927_s8, [#allocation12]  }
 0x7ab   : > { %1477 = dma.done.wait (%p181_p2), [#allocation12], 128  }
 0x7ac   : > { %1479 = vsyncadd (%p181_p2), [#allocation12], 4294967168 }
 0x7ad PF: > { %s1996_s26 = sld [smem:[#allocation20_spill]]  ;;  %p1998_p11 = scmp.ge.s32.totalorder %s1522_s16, 2 }
 0x7af   : > { %p1151_p0 = pnand %p1998_p11, %p1644_p6 }
 0x7b1   : > { %p1152_p5 = pneg %p1151_p0 }
 0x7b3   : > { %s943_s14 = sand.u32 1, %s1996_s26  }
 0x7b4   : > { %s944_s6 = scalar_lea.sflag [#allocation7], %s943_s14 }
 0x7b5   : > { %1481 = dma.done.wait (%p1152_p5), %s944_s6, 512  }
 0x7b6   : > { %1483 = vsyncadd (%p1152_p5), %s944_s6, 4294966784  ;;  %s1999_s27 = sadd.s32 4294967294, %s1522_s16   ;;  %p2001_p7 = pmov %p1998_p11 }
 0x7b7   : > { %s953_s2 = sand.u32 1, %s1999_s27  }
 0x7b8   : > { %p1154_p2 = pnand %p2001_p7, %p1656_p10  ;;  %s954_s17 = scalar_lea.sflag [#allocation12], %s953_s2 }
 0x7ba   : > { %p1155_p12 = pneg %p1154_p2 }
 0x7bc   : > { %1485 = dma.done.wait (%p1155_p12), %s954_s17, 512  }
 0x7bd   : > { %1487 = vsyncadd (%p1155_p12), %s954_s17, 4294966784  ;;  %s37_s16 = sadd.s32 1, %s1522_s16   ;;  %s2002_s3 = sld [smem:[#allocation25_spill]] }
 0x7be   : > { %p34_p1 = scmp.ge.s32.totalorder %s37_s16, 4   ;;  %s2003_s4 = sld [smem:[#allocation23_spill]] }
 0x7bf   : > { %s2004_s9 = smov %s1494_s10  ;;  %s2005_s10 = smov %s1498_s11 }
 0x7c0   : > { %s2006_s11 = smov %s1704_s0  ;;  %s2007_s0 = smov %s1506_s12 }
 0x7c1   : > { %s2008_s12 = smov %s1510_s13  ;;  %s2010_s14 = smov %s1518_s15 }
 0x7c2   :  { %36 = sbr.rel (!%p34_p1) target bundleno = 22 (0x16), region = 132 }
 0x7c3   : > { %s2009_s13 = smov %s2002_s3 }
 0x7c4   : > { %s2011_s15 = smov %s2003_s4 }
 0x7c7   :  { %960 = vsyncpa [#allocation6], 1 }
 0x7c8   :  { %962 = vsyncpa [#allocation6 + $0x1], 1 }
 0x7c9   :  { %963 = vsyncpa [#allocation9], 1 }
 0x7ca   :  { %964 = vsyncpa [#allocation7], 1 }
 0x7cb   :  { %966 = vsyncpa [#allocation7 + $0x1], 1 }
 0x7cc   :  { %967 = vsyncpa [#allocation12], 1 }
 0x7cd   :  { %969 = vsyncpa [#allocation12 + $0x1], 1 }

</bundles_post_ra>
